<compile_context>
chip_gen: v5e
topology: v5e:2x2
jax: 0.10.0
libtpu: 0.0.40
codegen_flags: <defaults>
</compile_context>

<pallas_src>
import functools

import jax
import jax.numpy as jnp
from jax import lax
from jax.experimental import pallas as pl
from jax.experimental.pallas import tpu as pltpu

NEG_SLOPE = 0.2     # PyG GATConv default LeakyReLU negative slope
HID_PAD = 128       # hidden dim padded to a full lane register
NEG_INF = -1e30


def _round_up(v, m):
    return ((v + m - 1) // m) * m


def _pad_to(a, shape):
    return jnp.pad(a, [(0, s - d) for s, d in zip(shape, a.shape)])


# -----------------------------------------------------------------------------
# Kernels
# -----------------------------------------------------------------------------
def _encode_kernel(x_ref, adj_ref, bias_ref, invdeg_ref,
                   wsage_ref, bs_ref, wgat_ref, cdst_ref, csrc_ref, bg_ref,
                   out_ref):
    """One branch: SAGEConv(mean aggr, root weight, bias, normalize=False)
    followed by a 1-head GATConv (self-loops, LeakyReLU(0.2), learnable residual).

    x_ref      : (N, F)  bf16 node features (F padded to 128 lanes).
    adj_ref    : (N, N)  bf16 edge-count matrix, adj[i, j] = #edges j -> i.
    bias_ref   : (N, N)  bf16 additive attention bias: log(multiplicity) on
                 edges, 0 on the forced self-loop diagonal, -1e30 on non-edges.
    invdeg_ref : (N, 1)  f32 exact 1/in-degree (0 for isolated nodes).
    wsage_ref  : (2F, H) bf16 fused [Wl ; Wr] SAGE projection.
    wgat_ref   : (H, 2H) bf16 fused [Wg | Wres] GAT projection slab.
    cdst/csrc  : (1, H)  f32 attention vectors pre-folded through Wg.
    """
    x = x_ref[...]                                        # (N, F)  bf16
    adj = adj_ref[...]                                    # (N, N)  bf16

    # ---------------- SAGEConv (mean aggregation, counts multiplicity) -------
    agg = jnp.dot(adj, x, preferred_element_type=jnp.float32) * invdeg_ref[...]
    xcat = jnp.concatenate([agg.astype(jnp.bfloat16), x], axis=-1)        # (N, 2F)
    h = (jnp.dot(xcat, wsage_ref[...], preferred_element_type=jnp.float32)
         + bs_ref[...])                                                   # (N, H) f32

    # ---------------- GATConv (1 head) ---------------------------------------
    hb = h.astype(jnp.bfloat16)
    t = jnp.dot(hb, wgat_ref[...], preferred_element_type=jnp.float32)    # (N, 2H)
    g = t[:, :HID_PAD]                                                    # (N, H)
    res = t[:, HID_PAD:]                                                  # (N, H)

    # attention logits: a_dst[i] + a_src[j]  (vectors folded through Wg)
    a_dst = jnp.sum(h * cdst_ref[...], axis=-1, keepdims=True)            # (N, 1)
    a_src = lax.dot_general(csrc_ref[...].astype(jnp.bfloat16), hb,
                            (((1,), (1,)), ((), ())),
                            preferred_element_type=jnp.float32)           # (1, N)
    e = a_dst + a_src
    e = jnp.where(e > 0.0, e, NEG_SLOPE * e)              # LeakyReLU(0.2)
    e = e + bias_ref[...].astype(jnp.float32)             # mask + self-loops + multiplicity
    e = e - jnp.max(e, axis=-1, keepdims=True)            # softmax over neighbors j
    p = jnp.exp(e)
    alpha = p * pl.reciprocal(jnp.sum(p, axis=-1, keepdims=True), approx=True)

    out_ref[...] = (jnp.dot(alpha.astype(jnp.bfloat16), g.astype(jnp.bfloat16),
                            preferred_element_type=jnp.float32)
                    + bg_ref[...] + res)                  # (N, H) lane-dense store


def _decoder_kernel(er_ref, ed_ref, w_ref, out_ref):
    """InnerProductDecoder: sigmoid(ER @ W @ ED^T).  The ED transpose is a
    contraction on the last dims (no in-kernel transpose materialization)."""
    t = jnp.dot(er_ref[...], w_ref[...], preferred_element_type=jnp.float32)
    logits = lax.dot_general(t.astype(jnp.bfloat16), ed_ref[...],
                             (((1,), (1,)), ((), ())),
                             preferred_element_type=jnp.float32)
    out_ref[...] = jax.nn.sigmoid(logits)


# -----------------------------------------------------------------------------
# Pallas wrappers
# -----------------------------------------------------------------------------
def encode_fused(xs, adjs, biases, invdegs, wp):
    """All three branch encoders in a single pallas_call; grid axis = branch."""
    nb, nmax, _ = xs.shape

    def bspec(a):
        return pl.BlockSpec((None,) + a.shape[1:], lambda b: (b, 0, 0))

    inputs = (xs, adjs, biases, invdegs,
              wp['wsage'], wp['bs'], wp['wgat'], wp['cdst'], wp['csrc'], wp['bg'])
    return pl.pallas_call(
        _encode_kernel,
        out_shape=jax.ShapeDtypeStruct((nb, nmax, HID_PAD), jnp.float32),
        grid=(nb,),
        in_specs=[bspec(a) for a in inputs],
        out_specs=pl.BlockSpec((None, nmax, HID_PAD), lambda b: (b, 0, 0)),
        compiler_params=pltpu.CompilerParams(
            dimension_semantics=("parallel",)),   # branches independent -> megacore
    )(*inputs)


def inner_product_decode(er, ed, w):
    ndp = er.shape[0]
    ncp = ed.shape[0]
    return pl.pallas_call(
        _decoder_kernel,
        out_shape=jax.ShapeDtypeStruct((ndp, ncp), jnp.float32),
        grid=(1,),
        in_specs=[pl.BlockSpec(er.shape, lambda i: (0, 0)),
                  pl.BlockSpec(ed.shape, lambda i: (0, 0)),
                  pl.BlockSpec(w.shape, lambda i: (0, 0))],
        out_specs=pl.BlockSpec((ndp, ncp), lambda i: (0, 0)),
        compiler_params=pltpu.CompilerParams(dimension_semantics=("arbitrary",)),
    )(er, ed, w)


# -----------------------------------------------------------------------------
# One-time preprocessing (hoisted out of the per-call path)
# -----------------------------------------------------------------------------
def graph_tensors(edge_idx, nmax):
    """edge_idx[0]=source, edge_idx[1]=target ("source_to_target" flow)."""
    src, dst = edge_idx[0], edge_idx[1]
    cnt = jnp.zeros((nmax, nmax), jnp.float32).at[dst, src].add(1.0)  # keep multiplicity
    deg = jnp.sum(cnt, axis=-1, keepdims=True)
    inv_deg = jnp.where(deg > 0.0, 1.0 / jnp.maximum(deg, 1.0), 0.0)
    eye = jnp.eye(nmax, dtype=jnp.float32)
    # GATConv default: remove existing self-loops, add exactly one per node.
    w_att = cnt * (1.0 - eye) + eye
    bias = jnp.where(w_att > 0.0, jnp.log(jnp.maximum(w_att, 1e-30)), NEG_INF)
    return cnt.astype(jnp.bfloat16), bias.astype(jnp.bfloat16), inv_deg


def prepare_graphs(x, edge_idx, x_drug, edge_idx_drug, x_cir, edge_idx_cir):
    n_het, fin = x.shape
    n_dr, n_ci = x_drug.shape[0], x_cir.shape[0]
    nmax = _round_up(max(n_het, n_dr, n_ci), 128)     # lane-dense node axis
    fin_p = _round_up(fin, 128)                       # lane-dense feature axis
    xs = jnp.stack([_pad_to(x, (nmax, fin_p)),
                    _pad_to(x_drug, (nmax, fin_p)),
                    _pad_to(x_cir, (nmax, fin_p))]).astype(jnp.bfloat16)
    gs = [graph_tensors(e, nmax) for e in (edge_idx, edge_idx_drug, edge_idx_cir)]
    return dict(xs=xs,
                adjs=jnp.stack([g[0] for g in gs]),
                biases=jnp.stack([g[1] for g in gs]),
                invdegs=jnp.stack([g[2] for g in gs]))


def prepare_params(params, fin):
    fin_p = _round_up(fin, 128)
    branches = [params['het'], params['drug'], params['cir']]

    def stack(fn, dtype):
        return jnp.stack([fn(b) for b in branches]).astype(dtype)

    wp = dict(
        # fused SAGE projection [Wl ; Wr]  (feature rows padded to 128 lanes)
        wsage=stack(lambda b: jnp.concatenate(
            [_pad_to(b['wl'], (fin_p, HID_PAD)),
             _pad_to(b['wr'], (fin_p, HID_PAD))], axis=0), jnp.bfloat16),
        bs=stack(lambda b: _pad_to(b['bs'], (1, HID_PAD)), jnp.float32),
        # fused GAT slab [Wg | Wres]
        wgat=stack(lambda b: jnp.concatenate(
            [_pad_to(b['wg'], (HID_PAD, HID_PAD)),
             _pad_to(b['wres'], (HID_PAD, HID_PAD))], axis=1), jnp.bfloat16),
        # attention vectors folded through Wg:  a_dst = h @ (Wg @ adst^T), etc.
        cdst=stack(lambda b: _pad_to(b['adst'] @ b['wg'].T, (1, HID_PAD)), jnp.float32),
        csrc=stack(lambda b: _pad_to(b['asrc'] @ b['wg'].T, (1, HID_PAD)), jnp.float32),
        bg=stack(lambda b: _pad_to(b['bg'], (1, HID_PAD)), jnp.float32),
    )
    dec_w = _pad_to(params['dec_w'], (HID_PAD, HID_PAD)).astype(jnp.bfloat16)
    return wp, dec_w


# -----------------------------------------------------------------------------
# Forward pass (jitted; only the kernels + tiny slice/add glue)
# -----------------------------------------------------------------------------
@functools.partial(jax.jit, static_argnames=("n_drug", "n_cir"))
def gsatsrbp_forward(graph, wp, dec_w, *, n_drug, n_cir):
    emb = encode_fused(graph['xs'], graph['adjs'], graph['biases'],
                       graph['invdegs'], wp)              # (3, nmax, HID_PAD)

    # nn.Dropout in eval mode == identity (inference semantics).
    # TODO(synk): InnerProductDecoder source was not provided with the module;
    # assumed: split hetero embedding at n_drug, fuse with the homogeneous
    # drug/cir embeddings (add), then sigmoid(ER @ W @ ED^T).
    ndp = _round_up(n_drug, 8)
    ncp = _round_up(n_cir, 128)                           # lane-dense decoder output
    er = (emb[0, :ndp] + emb[1, :ndp]).astype(jnp.bfloat16)          # (ndp, H)
    ed = emb[0, n_drug:n_drug + n_cir] + emb[2, :n_cir]               # (n_cir, H)
    ed = _pad_to(ed, (ncp, HID_PAD)).astype(jnp.bfloat16)

    scores = inner_product_decode(er, ed, dec_w)          # (ndp, ncp)
    return scores[:n_drug, :n_cir]


# -----------------------------------------------------------------------------
# Parameter init (matches the PyTorch layer structure)
# -----------------------------------------------------------------------------
def glorot(key, shape):
    fan_in, fan_out = shape[0], shape[-1]
    s = (6.0 / (fan_in + fan_out)) ** 0.5
    return jax.random.uniform(key, shape, jnp.float32, -s, s)


def init_branch(key, n_in, hid):
    ks = jax.random.split(key, 6)
    return dict(
        wl=glorot(ks[0], (n_in, hid)),        # SAGE: neighbor-aggregation linear
        wr=glorot(ks[1], (n_in, hid)),        # SAGE: root linear
        bs=jnp.zeros((1, hid), jnp.float32),  # SAGE bias
        wg=glorot(ks[2], (hid, hid)),         # GAT: linear
        asrc=glorot(ks[3], (1, hid)),         # GAT: attention vector (source)
        adst=glorot(ks[4], (1, hid)),         # GAT: attention vector (target)
        bg=jnp.zeros((1, hid), jnp.float32),  # GAT bias
        wres=glorot(ks[5], (hid, hid)),       # GAT learnable residual
    )


if __name__ == "__main__":
    key = jax.random.PRNGKey(0)
    n_drug, n_cir = 8, 12
    n_in, hid = 16, 32
    n_het = n_drug + n_cir

    k = jax.random.split(key, 10)
    x = jax.random.normal(k[0], (n_het, n_in), jnp.float32)
    x_drug = jax.random.normal(k[1], (n_drug, n_in), jnp.float32)
    x_cir = jax.random.normal(k[2], (n_cir, n_in), jnp.float32)

    edge_idx = jax.random.randint(k[3], (2, 40), 0, n_het)
    edge_idx_drug = jax.random.randint(k[4], (2, 16), 0, n_drug)
    edge_idx_cir = jax.random.randint(k[5], (2, 24), 0, n_cir)

    params = dict(
        het=init_branch(k[6], n_in, hid),
        drug=init_branch(k[7], n_in, hid),
        cir=init_branch(k[8], n_in, hid),
        dec_w=glorot(k[9], (hid, hid)),
    )

    # One-time preprocessing (static per dataset / checkpoint), then jitted forward.
    graph = prepare_graphs(x, edge_idx, x_drug, edge_idx_drug, x_cir, edge_idx_cir)
    wp, dec_w = prepare_params(params, n_in)

    out = gsatsrbp_forward(graph, wp, dec_w, n_drug=n_drug, n_cir=n_cir)
    out = jax.block_until_ready(out)
    assert out.shape == (n_drug, n_cir)
    assert bool(jnp.all(jnp.isfinite(out))) and bool(jnp.all((out >= 0) & (out <= 1)))
    print("KERNEL_OK")
</pallas_src>

<mosaic_0001>
module attributes {stable_mosaic.version = 11 : i64} {
  func.func @_encode_kernel(%arg0: i32, %arg1: memref<1x128x128xbf16, #tpu.memory_space<vmem>>, %arg2: memref<1x128x128xbf16, #tpu.memory_space<vmem>>, %arg3: memref<1x128x128xbf16, #tpu.memory_space<vmem>>, %arg4: memref<1x128x1xf32, #tpu.memory_space<vmem>>, %arg5: memref<1x256x128xbf16, #tpu.memory_space<vmem>>, %arg6: memref<1x1x128xf32, #tpu.memory_space<vmem>>, %arg7: memref<1x128x256xbf16, #tpu.memory_space<vmem>>, %arg8: memref<1x1x128xf32, #tpu.memory_space<vmem>>, %arg9: memref<1x1x128xf32, #tpu.memory_space<vmem>>, %arg10: memref<1x1x128xf32, #tpu.memory_space<vmem>>, %arg11: memref<1x128x128xf32, #tpu.memory_space<vmem>>) attributes {dimension_semantics = [#tpu.dimension_semantics<parallel>], iteration_bounds = array<i64: 3>, scalar_prefetch = 0 : i64, scratch_operands = 0 : i64, tpu.core_type = #tpu.core_type<tc>, window_params = [{transform_indices = @transform_0, window_bounds = array<i64: 1, 128, 128>}, {transform_indices = @transform_1, window_bounds = array<i64: 1, 128, 128>}, {transform_indices = @transform_2, window_bounds = array<i64: 1, 128, 128>}, {transform_indices = @transform_3, window_bounds = array<i64: 1, 128, 1>}, {transform_indices = @transform_4, window_bounds = array<i64: 1, 256, 128>}, {transform_indices = @transform_5, window_bounds = array<i64: 1, 1, 128>}, {transform_indices = @transform_6, window_bounds = array<i64: 1, 128, 256>}, {transform_indices = @transform_7, window_bounds = array<i64: 1, 1, 128>}, {transform_indices = @transform_8, window_bounds = array<i64: 1, 1, 128>}, {transform_indices = @transform_9, window_bounds = array<i64: 1, 1, 128>}, {transform_indices = @transform_10, window_bounds = array<i64: 1, 128, 128>}]} {
    %c0 = arith.constant 0 : index
    %c0_0 = arith.constant 0 : index
    %c0_1 = arith.constant 0 : index
    %0 = vector.load %arg1[%c0, %c0_0, %c0_1] : memref<1x128x128xbf16, #tpu.memory_space<vmem>>, vector<1x128x128xbf16>
    %1 = vector.shape_cast %0 : vector<1x128x128xbf16> to vector<128x128xbf16>
    %c0_2 = arith.constant 0 : index
    %c0_3 = arith.constant 0 : index
    %c0_4 = arith.constant 0 : index
    %2 = vector.load %arg2[%c0_2, %c0_3, %c0_4] : memref<1x128x128xbf16, #tpu.memory_space<vmem>>, vector<1x128x128xbf16>
    %3 = vector.shape_cast %2 : vector<1x128x128xbf16> to vector<128x128xbf16>
    %cst = arith.constant dense<0.000000e+00> : vector<128x128xf32>
    %4 = tpu.matmul %3, %1, %cst {dimension_numbers = #tpu.dot_dimension_numbers<[1], [0], [0], [1], [0, 0, 1, 1], [], []>} : vector<128x128xbf16>, vector<128x128xbf16>, vector<128x128xf32> -> vector<128x128xf32>
    %c0_5 = arith.constant 0 : index
    %c0_6 = arith.constant 0 : index
    %c0_7 = arith.constant 0 : index
    %5 = vector.load %arg4[%c0_5, %c0_6, %c0_7] : memref<1x128x1xf32, #tpu.memory_space<vmem>>, vector<1x128x1xf32>
    %6 = vector.shape_cast %5 : vector<1x128x1xf32> to vector<128x1xf32>
    %7 = vector.broadcast %6 : vector<128x1xf32> to vector<128x128xf32>
    %8 = arith.mulf %4, %7 : vector<128x128xf32>
    %9 = arith.truncf %8 : vector<128x128xf32> to vector<128x128xbf16>
    %10 = tpu.concatenate %9, %1 in 1 : vector<128x128xbf16>, vector<128x128xbf16> -> vector<128x256xbf16>
    %c0_8 = arith.constant 0 : index
    %c0_9 = arith.constant 0 : index
    %c0_10 = arith.constant 0 : index
    %11 = vector.load %arg5[%c0_8, %c0_9, %c0_10] : memref<1x256x128xbf16, #tpu.memory_space<vmem>>, vector<1x256x128xbf16>
    %12 = vector.shape_cast %11 : vector<1x256x128xbf16> to vector<256x128xbf16>
    %cst_11 = arith.constant dense<0.000000e+00> : vector<128x128xf32>
    %13 = tpu.matmul %10, %12, %cst_11 {dimension_numbers = #tpu.dot_dimension_numbers<[1], [0], [0], [1], [0, 0, 1, 1], [], []>} : vector<128x256xbf16>, vector<256x128xbf16>, vector<128x128xf32> -> vector<128x128xf32>
    %c0_12 = arith.constant 0 : index
    %c0_13 = arith.constant 0 : index
    %c0_14 = arith.constant 0 : index
    %14 = vector.load %arg6[%c0_12, %c0_13, %c0_14] : memref<1x1x128xf32, #tpu.memory_space<vmem>>, vector<1x1x128xf32>
    %15 = vector.shape_cast %14 : vector<1x1x128xf32> to vector<1x128xf32>
    %16 = vector.broadcast %15 : vector<1x128xf32> to vector<128x128xf32>
    %17 = arith.addf %13, %16 : vector<128x128xf32>
    %18 = arith.truncf %17 : vector<128x128xf32> to vector<128x128xbf16>
    %c0_15 = arith.constant 0 : index
    %c0_16 = arith.constant 0 : index
    %c0_17 = arith.constant 0 : index
    %19 = vector.load %arg7[%c0_15, %c0_16, %c0_17] : memref<1x128x256xbf16, #tpu.memory_space<vmem>>, vector<1x128x256xbf16>
    %20 = vector.shape_cast %19 : vector<1x128x256xbf16> to vector<128x256xbf16>
    %cst_18 = arith.constant dense<0.000000e+00> : vector<128x256xf32>
    %21 = tpu.matmul %18, %20, %cst_18 {dimension_numbers = #tpu.dot_dimension_numbers<[1], [0], [0], [1], [0, 0, 1, 1], [], []>} : vector<128x128xbf16>, vector<128x256xbf16>, vector<128x256xf32> -> vector<128x256xf32>
    %22 = vector.extract_strided_slice %21 {offsets = [0, 0], sizes = [128, 128], strides = [1, 1]} : vector<128x256xf32> to vector<128x128xf32>
    %23 = vector.extract_strided_slice %21 {offsets = [0, 128], sizes = [128, 128], strides = [1, 1]} : vector<128x256xf32> to vector<128x128xf32>
    %c0_19 = arith.constant 0 : index
    %c0_20 = arith.constant 0 : index
    %c0_21 = arith.constant 0 : index
    %24 = vector.load %arg8[%c0_19, %c0_20, %c0_21] : memref<1x1x128xf32, #tpu.memory_space<vmem>>, vector<1x1x128xf32>
    %25 = vector.shape_cast %24 : vector<1x1x128xf32> to vector<1x128xf32>
    %26 = vector.broadcast %25 : vector<1x128xf32> to vector<128x128xf32>
    %27 = arith.mulf %17, %26 : vector<128x128xf32>
    %cst_22 = arith.constant dense<0.000000e+00> : vector<128xf32>
    %28 = vector.multi_reduction <add>, %27, %cst_22 [1] : vector<128x128xf32> to vector<128xf32>
    %29 = vector.shape_cast %28 : vector<128xf32> to vector<128x1xf32>
    %c0_23 = arith.constant 0 : index
    %c0_24 = arith.constant 0 : index
    %c0_25 = arith.constant 0 : index
    %30 = vector.load %arg9[%c0_23, %c0_24, %c0_25] : memref<1x1x128xf32, #tpu.memory_space<vmem>>, vector<1x1x128xf32>
    %31 = vector.shape_cast %30 : vector<1x1x128xf32> to vector<1x128xf32>
    %32 = arith.truncf %31 : vector<1x128xf32> to vector<1x128xbf16>
    %cst_26 = arith.constant dense<0.000000e+00> : vector<1x128xf32>
    %33 = tpu.matmul %32, %18, %cst_26 {dimension_numbers = #tpu.dot_dimension_numbers<[1], [1], [0], [0], [0, 0, 1, 0], [], []>} : vector<1x128xbf16>, vector<128x128xbf16>, vector<1x128xf32> -> vector<1x128xf32>
    %34 = vector.broadcast %29 : vector<128x1xf32> to vector<128x128xf32>
    %35 = vector.broadcast %33 : vector<1x128xf32> to vector<128x128xf32>
    %36 = arith.addf %34, %35 : vector<128x128xf32>
    %cst_27 = arith.constant 0.000000e+00 : f32
    %37 = vector.broadcast %cst_27 : f32 to vector<128x128xf32>
    %38 = arith.cmpf ogt, %36, %37 : vector<128x128xf32>
    %cst_28 = arith.constant 2.000000e-01 : f32
    %39 = vector.broadcast %cst_28 : f32 to vector<128x128xf32>
    %40 = arith.mulf %39, %36 : vector<128x128xf32>
    %41 = arith.select %38, %36, %40 : vector<128x128xi1>, vector<128x128xf32>
    %c0_29 = arith.constant 0 : index
    %c0_30 = arith.constant 0 : index
    %c0_31 = arith.constant 0 : index
    %42 = vector.load %arg3[%c0_29, %c0_30, %c0_31] : memref<1x128x128xbf16, #tpu.memory_space<vmem>>, vector<1x128x128xbf16>
    %43 = vector.shape_cast %42 : vector<1x128x128xbf16> to vector<128x128xbf16>
    %44 = arith.extf %43 : vector<128x128xbf16> to vector<128x128xf32>
    %45 = arith.addf %41, %44 : vector<128x128xf32>
    %cst_32 = arith.constant dense<0xFF800000> : vector<128xf32>
    %46 = vector.multi_reduction <maximumf>, %45, %cst_32 [1] : vector<128x128xf32> to vector<128xf32>
    %47 = vector.shape_cast %46 : vector<128xf32> to vector<128x1xf32>
    %48 = vector.broadcast %47 : vector<128x1xf32> to vector<128x128xf32>
    %49 = arith.subf %45, %48 : vector<128x128xf32>
    %50 = math.exp %49 : vector<128x128xf32>
    %cst_33 = arith.constant dense<0.000000e+00> : vector<128xf32>
    %51 = vector.multi_reduction <add>, %50, %cst_33 [1] : vector<128x128xf32> to vector<128xf32>
    %52 = vector.shape_cast %51 : vector<128xf32> to vector<128x1xf32>
    %53 = tpu.reciprocal %52 {approx = true} : vector<128x1xf32> -> vector<128x1xf32>
    %54 = vector.broadcast %53 : vector<128x1xf32> to vector<128x128xf32>
    %55 = arith.mulf %50, %54 : vector<128x128xf32>
    %56 = arith.truncf %55 : vector<128x128xf32> to vector<128x128xbf16>
    %57 = arith.truncf %22 : vector<128x128xf32> to vector<128x128xbf16>
    %cst_34 = arith.constant dense<0.000000e+00> : vector<128x128xf32>
    %58 = tpu.matmul %56, %57, %cst_34 {dimension_numbers = #tpu.dot_dimension_numbers<[1], [0], [0], [1], [0, 0, 1, 1], [], []>} : vector<128x128xbf16>, vector<128x128xbf16>, vector<128x128xf32> -> vector<128x128xf32>
    %c0_35 = arith.constant 0 : index
    %c0_36 = arith.constant 0 : index
    %c0_37 = arith.constant 0 : index
    %59 = vector.load %arg10[%c0_35, %c0_36, %c0_37] : memref<1x1x128xf32, #tpu.memory_space<vmem>>, vector<1x1x128xf32>
    %60 = vector.shape_cast %59 : vector<1x1x128xf32> to vector<1x128xf32>
    %61 = vector.broadcast %60 : vector<1x128xf32> to vector<128x128xf32>
    %62 = arith.addf %58, %61 : vector<128x128xf32>
    %63 = arith.addf %62, %23 : vector<128x128xf32>
    %c0_38 = arith.constant 0 : index
    %c0_39 = arith.constant 0 : index
    %c0_40 = arith.constant 0 : index
    %64 = vector.load %arg11[%c0_38, %c0_39, %c0_40] : memref<1x128x128xf32, #tpu.memory_space<vmem>>, vector<1x128x128xf32>
    %65 = vector.shape_cast %64 : vector<1x128x128xf32> to vector<128x128xf32>
    %66 = vector.shape_cast %63 : vector<128x128xf32> to vector<1x128x128xf32>
    tpu.vector_store %arg11[%c0_38, %c0_39, %c0_40], %66 {strides = array<i32>} : memref<1x128x128xf32, #tpu.memory_space<vmem>>, vector<1x128x128xf32>,
    return
  }
  func.func @transform_0(%arg0: i32) -> (i32, i32, i32) {
    %c0_i32 = arith.constant 0 : i32
    %c0_i32_0 = arith.constant 0 : i32
    %c0_i32_1 = arith.constant 0 : i32
    return %arg0, %c0_i32, %c0_i32_0 : i32, i32, i32
  }
  func.func @transform_1(%arg0: i32) -> (i32, i32, i32) {
    %c0_i32 = arith.constant 0 : i32
    %c0_i32_0 = arith.constant 0 : i32
    %c0_i32_1 = arith.constant 0 : i32
    return %arg0, %c0_i32, %c0_i32_0 : i32, i32, i32
  }
  func.func @transform_2(%arg0: i32) -> (i32, i32, i32) {
    %c0_i32 = arith.constant 0 : i32
    %c0_i32_0 = arith.constant 0 : i32
    %c0_i32_1 = arith.constant 0 : i32
    return %arg0, %c0_i32, %c0_i32_0 : i32, i32, i32
  }
  func.func @transform_3(%arg0: i32) -> (i32, i32, i32) {
    %c0_i32 = arith.constant 0 : i32
    %c0_i32_0 = arith.constant 0 : i32
    %c0_i32_1 = arith.constant 0 : i32
    return %arg0, %c0_i32, %c0_i32_0 : i32, i32, i32
  }
  func.func @transform_4(%arg0: i32) -> (i32, i32, i32) {
    %c0_i32 = arith.constant 0 : i32
    %c0_i32_0 = arith.constant 0 : i32
    %c0_i32_1 = arith.constant 0 : i32
    return %arg0, %c0_i32, %c0_i32_0 : i32, i32, i32
  }
  func.func @transform_5(%arg0: i32) -> (i32, i32, i32) {
    %c0_i32 = arith.constant 0 : i32
    %c0_i32_0 = arith.constant 0 : i32
    %c0_i32_1 = arith.constant 0 : i32
    return %arg0, %c0_i32, %c0_i32_0 : i32, i32, i32
  }
  func.func @transform_6(%arg0: i32) -> (i32, i32, i32) {
    %c0_i32 = arith.constant 0 : i32
    %c0_i32_0 = arith.constant 0 : i32
    %c0_i32_1 = arith.constant 0 : i32
    return %arg0, %c0_i32, %c0_i32_0 : i32, i32, i32
  }
  func.func @transform_7(%arg0: i32) -> (i32, i32, i32) {
    %c0_i32 = arith.constant 0 : i32
    %c0_i32_0 = arith.constant 0 : i32
    %c0_i32_1 = arith.constant 0 : i32
    return %arg0, %c0_i32, %c0_i32_0 : i32, i32, i32
  }
  func.func @transform_8(%arg0: i32) -> (i32, i32, i32) {
    %c0_i32 = arith.constant 0 : i32
    %c0_i32_0 = arith.constant 0 : i32
    %c0_i32_1 = arith.constant 0 : i32
    return %arg0, %c0_i32, %c0_i32_0 : i32, i32, i32
  }
  func.func @transform_9(%arg0: i32) -> (i32, i32, i32) {
    %c0_i32 = arith.constant 0 : i32
    %c0_i32_0 = arith.constant 0 : i32
    %c0_i32_1 = arith.constant 0 : i32
    return %arg0, %c0_i32, %c0_i32_0 : i32, i32, i32
  }
  func.func @transform_10(%arg0: i32) -> (i32, i32, i32) {
    %c0_i32 = arith.constant 0 : i32
    %c0_i32_0 = arith.constant 0 : i32
    %c0_i32_1 = arith.constant 0 : i32
    return %arg0, %c0_i32, %c0_i32_0 : i32, i32, i32
  }
}

module attributes {stable_mosaic.version = 11 : i64} {
  func.func @_decoder_kernel(%arg0: i32, %arg1: memref<8x128xbf16, #tpu.memory_space<vmem>>, %arg2: memref<128x128xbf16, #tpu.memory_space<vmem>>, %arg3: memref<128x128xbf16, #tpu.memory_space<vmem>>, %arg4: memref<8x128xf32, #tpu.memory_space<vmem>>) attributes {dimension_semantics = [#tpu.dimension_semantics<arbitrary>], iteration_bounds = array<i64: 1>, scalar_prefetch = 0 : i64, scratch_operands = 0 : i64, tpu.core_type = #tpu.core_type<tc>, window_params = [{pipeline_mode = #tpu.pipeline_mode<synchronous>, transform_indices = @transform_0, window_bounds = array<i64: 8, 128>}, {pipeline_mode = #tpu.pipeline_mode<synchronous>, transform_indices = @transform_1, window_bounds = array<i64: 128, 128>}, {pipeline_mode = #tpu.pipeline_mode<synchronous>, transform_indices = @transform_2, window_bounds = array<i64: 128, 128>}, {pipeline_mode = #tpu.pipeline_mode<synchronous>, transform_indices = @transform_3, window_bounds = array<i64: 8, 128>}]} {
    %c0 = arith.constant 0 : index
    %c0_0 = arith.constant 0 : index
    %0 = vector.load %arg1[%c0, %c0_0] : memref<8x128xbf16, #tpu.memory_space<vmem>>, vector<8x128xbf16>
    %c0_1 = arith.constant 0 : index
    %c0_2 = arith.constant 0 : index
    %1 = vector.load %arg3[%c0_1, %c0_2] : memref<128x128xbf16, #tpu.memory_space<vmem>>, vector<128x128xbf16>
    %cst = arith.constant dense<0.000000e+00> : vector<8x128xf32>
    %2 = tpu.matmul %0, %1, %cst {dimension_numbers = #tpu.dot_dimension_numbers<[1], [0], [0], [1], [0, 0, 1, 1], [], []>} : vector<8x128xbf16>, vector<128x128xbf16>, vector<8x128xf32> -> vector<8x128xf32>
    %3 = arith.truncf %2 : vector<8x128xf32> to vector<8x128xbf16>
    %c0_3 = arith.constant 0 : index
    %c0_4 = arith.constant 0 : index
    %4 = vector.load %arg2[%c0_3, %c0_4] : memref<128x128xbf16, #tpu.memory_space<vmem>>, vector<128x128xbf16>
    %cst_5 = arith.constant dense<0.000000e+00> : vector<8x128xf32>
    %5 = tpu.matmul %3, %4, %cst_5 {dimension_numbers = #tpu.dot_dimension_numbers<[1], [1], [0], [0], [0, 0, 1, 0], [], []>} : vector<8x128xbf16>, vector<128x128xbf16>, vector<8x128xf32> -> vector<8x128xf32>
    %6 = arith.negf %5 : vector<8x128xf32>
    %7 = math.exp %6 : vector<8x128xf32>
    %cst_6 = arith.constant 1.000000e+00 : f32
    %8 = vector.broadcast %cst_6 : f32 to vector<8x128xf32>
    %9 = arith.addf %8, %7 : vector<8x128xf32>
    %10 = arith.divf %8, %9 : vector<8x128xf32>
    %c0_7 = arith.constant 0 : index
    %c0_8 = arith.constant 0 : index
    %11 = vector.load %arg4[%c0_7, %c0_8] : memref<8x128xf32, #tpu.memory_space<vmem>>, vector<8x128xf32>
    tpu.vector_store %arg4[%c0_7, %c0_8], %10 {strides = array<i32>} : memref<8x128xf32, #tpu.memory_space<vmem>>, vector<8x128xf32>,
    return
  }
  func.func @transform_0(%arg0: i32) -> (i32, i32) {
    %c0_i32 = arith.constant 0 : i32
    %c0_i32_0 = arith.constant 0 : i32
    %c0_i32_1 = arith.constant 0 : i32
    return %c0_i32, %c0_i32_0 : i32, i32
  }
  func.func @transform_1(%arg0: i32) -> (i32, i32) {
    %c0_i32 = arith.constant 0 : i32
    %c0_i32_0 = arith.constant 0 : i32
    %c0_i32_1 = arith.constant 0 : i32
    return %c0_i32, %c0_i32_0 : i32, i32
  }
  func.func @transform_2(%arg0: i32) -> (i32, i32) {
    %c0_i32 = arith.constant 0 : i32
    %c0_i32_0 = arith.constant 0 : i32
    %c0_i32_1 = arith.constant 0 : i32
    return %c0_i32, %c0_i32_0 : i32, i32
  }
  func.func @transform_3(%arg0: i32) -> (i32, i32) {
    %c0_i32 = arith.constant 0 : i32
    %c0_i32_0 = arith.constant 0 : i32
    %c0_i32_1 = arith.constant 0 : i32
    return %c0_i32, %c0_i32_0 : i32, i32
  }
}

</mosaic_0001>

<bundles_post_ra>
// kernel: gsatsrbp_forward.3
= control target key start
LH: loop header
LB: loop body
LE: loop exit
PB: predicated region body
PF: predicated region fallthrough
CT: control target
= control target key end

     0   :  { %s394_s0 = inlined_call_operand.vmem [shape: bf16[8,128], index: 0, kind: input, shape index: {}]   ;;  %s395_s1 = inlined_call_operand.vmem [shape: bf16[128,128], index: 1, kind: input, shape index: {}]   ;;  %s396_s2 = inlined_call_operand.vmem [shape: bf16[128,128], index: 2, kind: input, shape index: {}]   ;;  %s397_s3 = inlined_call_operand.hbm [shape: f32[8,128], index: 3, kind: output, shape index: {}]  }
   0x1   :  { %v279_v0 = vld [vmem:[%s396_s2 + $0x38] sm:$0xff]  ;;  %v278_v1 = vld [vmem:[%s396_s2 + $0x30] sm:$0xff] }
   0x2   :  { %80 = vmatpush.bf16.msra.mxu0 %v279_v0  ;;  %v287_v2 = vld [vmem:[%s395_s1 + $0x38] sm:$0xff] }
   0x3   :  { %8 = vsyncpa [#allocation3], 0  ;;  %158 = vmatpush.bf16.xpose.msra.mxu1 %v287_v2  ;;  %v277_v3 = vld [vmem:[%s396_s2 + $0x28] sm:$0xff]  ;;  %v286_v4 = vld [vmem:[%s395_s1 + $0x30] sm:$0xff]  ;;  %s198_s20 = sshll.u32 %s397_s3, 4  ;;  %s199_s20 = int_to_ptr.hbm [resolvable:$true] %s198_s20 }
   0x4   :  { %v276_v5 = vld [vmem:[%s396_s2 + $0x20] sm:$0xff]  ;;  %v275_v6 = vld [vmem:[%s396_s2 + $0x18] sm:$0xff]  ;;  %v285_v7 = vld [vmem:[%s395_s1 + $0x28] sm:$0xff] }
   0x5   :  { %v274_v8 = vld [vmem:[%s396_s2 + $0x10] sm:$0xff]  ;;  %v273_v9 = vld [vmem:[%s396_s2 + $0x8] sm:$0xff]  ;;  %v284_v10 = vld [vmem:[%s395_s1 + $0x20] sm:$0xff] }
   0x6   :  { %81 = vmatpush.bf16.msra.mxu0 %v278_v1  ;;  %v272_v11 = vld [vmem:[%s396_s2] sm:$0xff]  ;;  %v283_v13 = vld [vmem:[%s395_s1 + $0x18] sm:$0xff]  ;;  %v282_v14 = vld [vmem:[%s395_s1 + $0x10] sm:$0xff] }
   0x7   :  { %v15_v12 = vld [vmem:[%s394_s0] sm:$0xf]  ;;  %v281_v15 = vld [vmem:[%s395_s1 + $0x8] sm:$0xff]  ;;  %s319_s0 = smov [#allocation2]  }
   0x8   :  { %v280_v16 = vld [vmem:[%s395_s1] sm:$0xff]  ;;  %s196_s1 = sshll.u32 %s319_s0, 4  ;;  %s197_s1 = int_to_ptr.vmem [resolvable:$true] %s196_s1 }
   0xa   :  { %82 = vmatpush.bf16.msra.mxu0 %v277_v3 }
   0xb   :  { %159 = vmatpush.bf16.xpose.msra.mxu1 %v286_v4 }
   0xe   :  { %83 = vmatpush.bf16.msra.mxu0 %v276_v5 }
  0x12   :  { %84 = vmatpush.bf16.msra.mxu0 %v275_v6 }
  0x13   :  { %160 = vmatpush.bf16.xpose.msra.mxu1 %v285_v7 }
  0x16   :  { %85 = vmatpush.bf16.msra.mxu0 %v274_v8 }
  0x1a   :  { %86 = vmatpush.bf16.msra.mxu0 %v273_v9 }
  0x1b   :  { %161 = vmatpush.bf16.xpose.msra.mxu1 %v284_v10 }
  0x1e   :  { %87 = vmatpush.bf16.msra.mxu0 %v272_v11 }
  0x21   :  { %88 = vmatmul.bf16.vlgmr.msra.gmra.mxu0 %v15_v12 }
  0x23   :  { %162 = vmatpush.bf16.xpose.msra.mxu1 %v283_v13 }
  0x2b   :  { %163 = vmatpush.bf16.xpose.msra.mxu1 %v282_v14 }
  0x33   :  { %164 = vmatpush.bf16.xpose.msra.mxu1 %v281_v15 }
  0x3b   :  { %165 = vmatpush.bf16.xpose.msra.mxu1 %v280_v16 }
  0x9e   :  { %v89_v17 = vpop.f32.mrf.mxu0 }
  0x9f   :  { %v93_v18 = vpack.c.bf16 %v89_v17, %v89_v17 }
  0xa1   :  { %166 = vmatmul.bf16.vlgmr.msra.gmra.mxu1 %v93_v18 }
  0xa6   :  { %v91_v19 = vpop.f32.mrf.mxu0 }
 0x11e   :  { %v167_v20 = vpop.f32.mrf.mxu1 }
 0x11f   :  { %v271_v21 = vmul.f32 -1.442695, %v167_v20 }
 0x121   :  { %289 = vpow2.f32 %v271_v21 }
 0x126   :  { %v169_v22 = vpop.f32.mrf.mxu1 }
 0x127   :  { %v290_v23 = vpop.eup %289 }
 0x128   :  { %v174_v24 = vadd.f32 1.0, %v290_v23 }
 0x12a   :  { %291 = vrcp.f32 %v174_v24  ;;  %v186_v28 = vand.u32 2147483648, %v174_v24  ;;  %v184_v30 = vand.u32 2147483647, %v174_v24  ;;  %vm180_vm1 = vweird.f32 %v174_v24 }
 0x12c   :  { %v187_v32 = vor.u32 1.1754944e-38, %v186_v28  ;;  %vm185_vm3 = vcmp.eq.f32.partialorder %v184_v30, 8.507059e+37 }
 0x130   :  { %v292_v25 = vpop.eup %291 }
 0x131   :  { %v176_v26 = vmul.f32 %v292_v25, %v174_v24  ;;  %vm181_vm0 = vweird.f32 %v292_v25 }
 0x132   :  { %vm182_vm2 = vmor %vm180_vm1, %vm181_vm0 }
 0x133   :  { %v177_v27 = vsub.f32 1.0, %v176_v26 }
 0x135   :  { %v178_v29 = vmul.f32 %v292_v25, %v177_v27 }
 0x137   :  { %v179_v31 = vadd.f32 %v292_v25, %v178_v29 }
 0x139   :  { %v183_v33 = vsel %vm182_vm2, %v292_v25, %v179_v31 }
 0x13a   :  { %v188_v34 = vsel %vm185_vm3, %v187_v32, %v183_v33 }
 0x13b   :  { %190 = vst [vmem:[#allocation2] sm:$0xff] %v188_v34 }
 0x13c   :  { %201 = dma.vmem_to_hbm [thread:$0]  %s197_s1, 128, %s199_s20, [#allocation3]  }
 0x13d   :  { %317 = dma.done.wait [#allocation3], 128  }
 0x13e   :  { %318 = vsyncadd [#allocation3], 4294967168 }
 0x13f   :  { %206 = vsyncpa [#allocation3], 1 }

// kernel: gsatsrbp_forward.2
= control target key start
LH: loop header
LB: loop body
LE: loop exit
PB: predicated region body
PF: predicated region fallthrough
CT: control target
= control target key end

     0   :  { %s3411_s0 = inlined_call_operand.hbm [shape: bf16[3,128,128], index: 0, kind: input, shape index: {}]   ;;  %s3412_s1 = inlined_call_operand.hbm [shape: bf16[3,128,128], index: 1, kind: input, shape index: {}]   ;;  %s3413_s2 = inlined_call_operand.hbm [shape: bf16[3,128,128], index: 2, kind: input, shape index: {}]   ;;  %s3414_s3 = inlined_call_operand.vmem [shape: f32[3,128,1], index: 3, kind: input, shape index: {}]   ;;  %s3415_s4 = inlined_call_operand.vmem [shape: bf16[3,256,128], index: 4, kind: input, shape index: {}]   ;;  %s3416_s5 = inlined_call_operand.vmem [shape: f32[3,1,128], index: 5, kind: input, shape index: {}]   ;;  %s3417_s6 = inlined_call_operand.hbm [shape: bf16[3,128,256], index: 6, kind: input, shape index: {}]   ;;  %s3418_s7 = inlined_call_operand.vmem [shape: f32[3,1,128], index: 7, kind: input, shape index: {}]   ;;  %s3419_s8 = inlined_call_operand.vmem [shape: f32[3,1,128], index: 8, kind: input, shape index: {}]   ;;  %s3420_s9 = inlined_call_operand.hbm [shape: f32[3,1,128], index: 9, kind: input, shape index: {}]   ;;  %s3421_s10 = inlined_call_operand.vmem [shape: f32[3,128,128], index: 10, kind: output, shape index: {}]  }
   0x1   :  { %3432 = sst [smem:[#allocation16_spill]] %s3412_s1 }
   0x2   :  { %3433 = sst [smem:[#allocation17_spill]] %s3415_s4 }
   0x3   :  { %3434 = sst [smem:[#allocation18_spill]] %s3416_s5 }
   0x4   :  { %3435 = sst [smem:[#allocation19_spill]] %s3417_s6 }
   0x5   :  { %3436 = sst [smem:[#allocation20_spill]] %s3418_s7 }
   0x6   :  { %3437 = sst [smem:[#allocation21_spill]] %s3419_s8 }
   0x7   :  { %3438 = sst [smem:[#allocation22_spill]] %s3421_s10 }
   0x8   :  { %15 = vsyncpa [#allocation3], 0 }
   0x9   :  { %17 = vsyncpa [#allocation3 + $0x1], 0 }
   0xa   :  { %18 = vsyncpa [#allocation5], 0 }
   0xb   :  { %20 = vsyncpa [#allocation5 + $0x1], 0 }
   0xc   :  { %21 = vsyncpa [#allocation8], 0 }
   0xd   :  { %23 = vsyncpa [#allocation8 + $0x1], 0  ;;  %s2747_s13 = smov 0   ;;  %s2749_s14 = smov 0  }
   0xe   :  { %s2751_s15 = smov 0   ;;  %s2753_s16 = smov 0  }
   0xf LB: > { %3439 = sst [smem:[#allocation13_spill]] %s2681_s15  ;;  %s2766_s17 = sadd.s32 4294967295, %s2685_s16   ;;  %s2685_s16 = sphi %s2753_s16, %s3456_s16   ;;  %s2681_s15 = sphi %s2751_s15, %s3461_s15   ;;  %s2677_s14 = sphi %s2749_s14, %s3460_s14   ;;  %s2673_s13 = sphi %s2747_s13, %s3459_s13  }
  0x10   : > { %s2769_s18 = sadd.s32 1, %s2685_s16   ;;  %s36_s20 = sadd.s32 1, %s2681_s15 }
  0x11   : > { %3440 = sst [smem:[#allocation14_spill]] %s2769_s18  ;;  %s33_s19 = ssub.s32 %s2685_s16, %s2769_s18 }
  0x12   : > { %p34_p0 = scmp.eq.s32.totalorder %s33_s19, 0  ;;  %p43_p1 = scmp.ne.s32.totalorder %s2681_s15, %s2677_s14 }
  0x13   : > { %p44_p2 = scmp.eq.s32.totalorder %s2685_s16, 0  ;;  %p49_p3 = scmp.ne.s32.totalorder %s2677_s14, %s2673_s13 }
  0x14   : > { %s2779_s21 = scalar_select %p34_p0, %s2681_s15, %s36_s20  }
  0x15   : > { %p45_p4 = por %p44_p2, %p43_p1  ;;  %p50_p5 = scmp.eq.s32.totalorder %s2766_s17, 0 }
  0x16   : > { %3441 = sst [smem:[#allocation15_spill]] %s2779_s21  ;;  %p2385_p6 = scmp.lt.s32.totalorder %s2685_s16, 3 }
  0x17   : > { %p2783_p7 = por %p50_p5, %p49_p3  ;;  %s2788_s23 = sand.u32 1, %s2681_s15  }
  0x18   : > { %s2791_s24 = sshll.u32 %s2788_s23, 6  ;;  %s2794_s25 = sshll.u32 %s2685_s16, 6 }
  0x19   : > { %p2796_p8 = pnand %p2385_p6, %p45_p4  ;;  %s3423_s27 = sand.u32 1, %s2685_s16  }
  0x1a   : > { %s3444_s1 = sld [smem:[#allocation16_spill]]  ;;  %s359_s12 = scalar_lea.vmem [#allocation4], %s2791_s24 }
  0x1b   : > { %s367_s13 = sshll.u32 %s359_s12, 4  ;;  %s2808_s19 = scalar_lea.sflag [#allocation5], %s3423_s27  ;;  %s368_s13 = int_to_ptr.vmem [resolvable:$true] %s367_s13 }
  0x1c   : > { %p2812_p10 = pneg %p2796_p8 }
  0x20   : > { %s364_s30 = scalar_lea.hbm %s3444_s1, %s2794_s25 }
  0x21   : > { %s365_s11 = sshll.u32 %s364_s30, 4  ;;  %s2500_s30 = scalar_lea.hbm %s3444_s1, 192  ;;  %s366_s11 = int_to_ptr.hbm [resolvable:$true] %s365_s11 }
  0x22   : > { %s2493_s20 = sshra.s32 %s366_s11, 4  ;;  %s2494_s20 = int_to_ptr.hbm [resolvable:$true] %s2493_s20 }
  0x23   : > { %s2495_s21 = scalar_lea.hbm %s2494_s20, 64  ;;  %p2501_p13 = scmp.lt.s32.totalorder %s2494_s20, %s3444_s1 }
  0x24   : > { %p2496_p9 = scmp.ne.s32.totalorder %s2494_s20, %s2495_s21  ;;  %p2502_p0 = scmp.lt.s32.totalorder %s2500_s30, %s2495_s21 }
  0x26   : > { %p2498_p11 = pnand %p2812_p10, %p2496_p9  ;;  %p2503_p1 = por %p2502_p0, %p2501_p13 }
  0x28   : > { %p2499_p12 = pneg %p2498_p11 }
  0x2a   : > { %p2504_p2 = pnand %p2503_p1, %p2499_p12 }
  0x2c   : > { %2507 = shalt.err (!%p2504_p2)
}
  0x2d   : > { %s3426_s18 = smov 64   ;;  %s3428_s10 = smov 4  }
  0x2e   : > { %2375 = dma.hbm_to_vmem [thread:$0]  (!%p2796_p8), %s366_s11, 1024, %s368_s13, %s2808_s19, %s3426_s18, %s3426_s18, %s3428_s10  }
  0x2f   : > { %p2044_p3 = scmp.ge.s32.totalorder %s2685_s16, 1  ;;  %p470_p4 = scmp.lt.s32.totalorder %s2685_s16, 4 }
  0x30   : > { %s2041_s21 = sshll.u32 %s2788_s23, 7  ;;  %s2252_s20 = sshll.u32 %s2685_s16, 7 }
  0x31   : > { %p2833_p5 = pnand %p2044_p3, %p470_p4  ;;  %s425_s28 = scalar_lea.vmem [#allocation7], %s2041_s21 }
  0x32   : > { %s433_s29 = sshll.u32 %s425_s28, 4  ;;  %s3447_s6 = sld [smem:[#allocation19_spill]]  ;;  %s434_s29 = int_to_ptr.vmem [resolvable:$true] %s433_s29 }
  0x33   : > { %s3448_s4 = sand.u32 1, %s2685_s16  }
  0x34   : > { %s2843_s11 = scalar_lea.sflag [#allocation8], %s3448_s4 }
  0x38   : > { %s430_s1 = scalar_lea.hbm %s3447_s6, %s2252_s20  ;;  %s2530_s28 = scalar_lea.hbm %s3447_s6, 384 }
  0x39   : > { %s431_s8 = sshll.u32 %s430_s1, 4  ;;  %s432_s8 = int_to_ptr.hbm [resolvable:$true] %s431_s8 }
  0x3a   : > { %s2523_s13 = sshra.s32 %s432_s8, 4  ;;  %s2524_s13 = int_to_ptr.hbm [resolvable:$true] %s2523_s13 }
  0x3b   : > { %s2525_s18 = scalar_lea.hbm %s2524_s13, 128  ;;  %p2531_p12 = scmp.lt.s32.totalorder %s2524_s13, %s3447_s6 }
  0x3c   : > { %p2526_p6 = scmp.ne.s32.totalorder %s2524_s13, %s2525_s18  ;;  %p2532_p13 = scmp.lt.s32.totalorder %s2530_s28, %s2525_s18 }
  0x3e   : > { %p2528_p9 = pnand %p2526_p6, %p2812_p10  ;;  %p2533_p0 = por %p2532_p13, %p2531_p12 }
  0x40   : > { %p2529_p11 = pneg %p2528_p9 }
  0x42   : > { %p2534_p1 = pnand %p2533_p0, %p2529_p11 }
  0x44   : > { %2537 = shalt.err (!%p2534_p1)
}
  0x45   : > { %s2689_s1 = smov 128   ;;  %s2690_s4 = smov 8  }
  0x46   : > { %2381 = dma.hbm_to_vmem [thread:$0]  (!%p2796_p8), %s432_s8, 2048, %s434_s29, %s2843_s11, %s2689_s1, %s2689_s1, %s2690_s4  }
  0x47   : > { %s342_s12 = scalar_lea.hbm %s3411_s0, %s2794_s25  ;;  %s337_s7 = scalar_lea.vmem [#allocation2], %s2791_s24 }
  0x48   : > { %s345_s13 = sshll.u32 %s337_s7, 4  ;;  %s343_s18 = sshll.u32 %s342_s12, 4  ;;  %s346_s13 = int_to_ptr.vmem [resolvable:$true] %s345_s13  ;;  %s344_s18 = int_to_ptr.hbm [resolvable:$true] %s343_s18 }
  0x49   : > { %s334_s21 = scalar_lea.sflag [#allocation3], %s2788_s23  ;;  %s2553_s28 = sshra.s32 %s344_s18, 4  ;;  %s2554_s28 = int_to_ptr.hbm [resolvable:$true] %s2553_s28 }
  0x4a   : > { %s2555_s30 = scalar_lea.hbm %s2554_s28, 64  ;;  %s2560_s8 = scalar_lea.hbm %s3411_s0, 192 }
  0x4b   : > { %p2556_p2 = scmp.ne.s32.totalorder %s2554_s28, %s2555_s30  ;;  %p2561_p6 = scmp.lt.s32.totalorder %s2554_s28, %s3411_s0 }
  0x4c   : > { %p2562_p9 = scmp.lt.s32.totalorder %s2560_s8, %s2555_s30 }
  0x4d   : > { %p2558_p3 = pnand %p2556_p2, %p2812_p10 }
  0x4e   : > { %p2563_p11 = por %p2562_p9, %p2561_p6 }
  0x4f   : > { %p2559_p4 = pneg %p2558_p3 }
  0x51   : > { %p2564_p12 = pnand %p2563_p11, %p2559_p4 }
  0x53   : > { %2567 = shalt.err (!%p2564_p12)
}
  0x54   : > { %s3449_s4 = smov 4   ;;  %s3450_s10 = smov 64  }
  0x55   : > { %2372 = dma.hbm_to_vmem [thread:$0]  (!%p2796_p8), %s344_s18, 1024, %s346_s13, %s334_s21, %s3450_s10, %s3450_s10, %s3449_s4  }
  0x56   : > { %s386_s6 = scalar_lea.hbm %s3413_s2, %s2794_s25  ;;  %s381_s12 = scalar_lea.vmem [#allocation6], %s2791_s24 }
  0x57   : > { %s389_s7 = sshll.u32 %s381_s12, 4  ;;  %s387_s28 = sshll.u32 %s386_s6, 4  ;;  %s390_s7 = int_to_ptr.vmem [resolvable:$true] %s389_s7  ;;  %s388_s28 = int_to_ptr.hbm [resolvable:$true] %s387_s28 }
  0x58   : > { %s2583_s30 = sshra.s32 %s388_s28, 4  ;;  %s2590_s13 = scalar_lea.hbm %s3413_s2, 192  ;;  %s2584_s30 = int_to_ptr.hbm [resolvable:$true] %s2583_s30 }
  0x59   : > { %s2585_s8 = scalar_lea.hbm %s2584_s30, 64  ;;  %p2591_p2 = scmp.lt.s32.totalorder %s2584_s30, %s3413_s2 }
  0x5a   : > { %p2586_p13 = scmp.ne.s32.totalorder %s2584_s30, %s2585_s8  ;;  %p2592_p3 = scmp.lt.s32.totalorder %s2590_s13, %s2585_s8 }
  0x5c   : > { %p2588_p0 = pnand %p2586_p13, %p2812_p10  ;;  %p2593_p4 = por %p2592_p3, %p2591_p2 }
  0x5e   : > { %p2589_p1 = pneg %p2588_p0 }
  0x60   : > { %p2594_p6 = pnand %p2593_p4, %p2589_p1 }
  0x62   : > { %2597 = shalt.err (!%p2594_p6)
}
  0x63   : > { %2378 = dma.hbm_to_vmem [thread:$0]  (!%p2796_p8), %s388_s28, 1024, %s390_s7, %s2808_s19, %s3450_s10, %s3450_s10, %s3449_s4  }
  0x64   : > { %s461_s20 = scalar_lea.hbm %s3420_s9, %s2685_s16  ;;  %s458_s5 = scalar_lea.vmem [#allocation9], %s2788_s23 }
  0x65   : > { %s465_s6 = sshll.u32 %s458_s5, 4  ;;  %s463_s12 = sshll.u32 %s461_s20, 4  ;;  %s466_s6 = int_to_ptr.vmem [resolvable:$true] %s465_s6  ;;  %s464_s12 = int_to_ptr.hbm [resolvable:$true] %s463_s12 }
  0x66   : > { %s2613_s30 = sshra.s32 %s464_s12, 4  ;;  %s2620_s19 = scalar_lea.hbm %s3420_s9, 3  ;;  %s2614_s30 = int_to_ptr.hbm [resolvable:$true] %s2613_s30 }
  0x67   : > { %s2615_s8 = scalar_lea.hbm %s2614_s30, 1  ;;  %p2621_p13 = scmp.lt.s32.totalorder %s2614_s30, %s3420_s9 }
  0x68   : > { %p2616_p9 = scmp.ne.s32.totalorder %s2614_s30, %s2615_s8  ;;  %p2622_p0 = scmp.lt.s32.totalorder %s2620_s19, %s2615_s8 }
  0x6a   : > { %p2618_p11 = pnand %p2616_p9, %p2812_p10  ;;  %p2623_p1 = por %p2622_p0, %p2621_p13 }
  0x6c   : > { %p2619_p12 = pneg %p2618_p11 }
  0x6e   : > { %p2624_p2 = pnand %p2623_p1, %p2619_p12 }
  0x70   : > { %2627 = shalt.err (!%p2624_p2)
}
  0x71   : > { %2384 = dma.hbm_to_vmem [thread:$0]  (!%p2796_p8), %s464_s12, 16, %s466_s6, %s2843_s11  }
  0x72   : > { %474 = sbr.rel (%p2833_p5) target bundleno = 1300 (0x514), region = 60  ;;  %s2913_s15 = sand.u32 (!%p2833_p5), 1, %s2677_s14  }
  0x73   : > { %s2045_s16 = sshll.u32 (!%p2833_p5), %s2913_s15, 6  ;;  %s477_s23 = scalar_lea.sflag (!%p2833_p5), [#allocation3], %s2913_s15 }
  0x74   : > { %s2917_s7 = scalar_lea.vmem (!%p2833_p5), [#allocation2], %s2045_s16 }
  0x77   : > { %2660 = dma.done.wait (%p2783_p7), %s477_s23, 1024  }
  0x78   : > { %2662 = vsyncadd (%p2783_p7), %s477_s23, 4294966272  ;;  %s486_s26 = sand.u32 1, %s2766_s17   ;;  %s2924_s11 = scalar_lea.vmem [#allocation4], %s2045_s16 }
  0x79   : > { %s487_s27 = scalar_lea.sflag [#allocation5], %s486_s26 }
  0x7a   : > { %2664 = dma.done.wait (%p2783_p7), %s487_s27, 2048  }
  0x7b   : > { %2666 = vsyncadd (%p2783_p7), %s487_s27, 4294965248  ;;  %s2048_s28 = sshll.u32 %s2913_s15, 7  ;;  %s2931_s13 = scalar_lea.vmem [#allocation6], %s2045_s16 }
  0x7c   : > { %s507_s18 = scalar_lea.sflag [#allocation8], %s486_s26  ;;  %s2933_s21 = scalar_lea.vmem [#allocation7], %s2048_s28 }
  0x7d   : > { %2668 = dma.done.wait (%p2783_p7), %s507_s18, 2064  }
  0x7e   : > { %2670 = vsyncadd (%p2783_p7), %s507_s18, 4294965232  ;;  %p595_p8 = scmp.lt.s32.totalorder %s2766_s17, 2  ;;  %v2691_v0 = vmov 0   ;;  %s3451_s12 = sld [smem:[#allocation18_spill]]  ;;  %v2957_v1 = vld [vmem:[%s2917_s7 + $0x38] sm:$0xff]  ;;  %v2967_v3 = vld [vmem:[%s2917_s7 + $0x30] sm:$0xff] }
  0x7f   : > { %2423 = vset.pattern.permute.xlu0 %v2691_v0  ;;  %2424 = vset.pattern.permute.xlu1 %v2691_v0  ;;  %s3452_s1 = sld [smem:[#allocation20_spill]]  ;;  %v2973_v5 = vld [vmem:[%s2917_s7 + $0x28] sm:$0xff]  ;;  %v2979_v7 = vld [vmem:[%s2917_s7 + $0x20] sm:$0xff]  ;;  %v2985_v9 = vld [vmem:[%s2917_s7 + $0x18] sm:$0xff] }
  0x80   : > { %s3463_s17 = smov (!%p595_p8, %s2766_s17), 2  ;;  %2425 = vset.pattern.permute.xlu2 %v2691_v0  ;;  %747 = vmatpush.bf16.msra.mxu0 %v2957_v1  ;;  %v2992_v12 = vld [vmem:[%s2917_s7 + $0x10] sm:$0xff]  ;;  %v2998_v14 = vld [vmem:[%s2917_s7 + $0x8] sm:$0xff]  ;;  %v2256_v16 = vld [vmem:[%s2917_s7] sm:$0xff]  ;;  %s3453_s16 = sld [smem:[#allocation17_spill]] }
  0x81   : > { %s2944_s24 = sshll.u32 %s3463_s17, 7  ;;  %2343 = vmatpush.bf16.msra.mxu3 %v2957_v1  ;;  %v2264_v18 = vld [vmem:[%s2924_s11] sm:$0xff]  ;;  %v2269_v19 = vld [vmem:[%s2924_s11 + $0x28] sm:$0xff]  ;;  %v2270_v26 = vld [vmem:[%s2924_s11 + $0x30] sm:$0xff] }
  0x82   : > { %s2950_s20 = scalar_lea.vmem %s3414_s3, %s2944_s24  ;;  %v2265_v25 = vld [vmem:[%s2924_s11 + $0x8] sm:$0xff]  ;;  %v2266_v28 = vld [vmem:[%s2924_s11 + $0x10] sm:$0xff]  ;;  %v2271_v29 = vld [vmem:[%s2924_s11 + $0x38] sm:$0xff] }
  0x83   : > { %v796_v2 = vld [vmem:[%s2950_s20] sm:$0xff]  ;;  %v798_v4 = vld [vmem:[%s2950_s20 + $0x10] sm:$0xff]  ;;  %v797_v6 = vld [vmem:[%s2950_s20 + $0x8] sm:$0xff] }
  0x84   : > { %s607_s30 = scalar_lea.vmem %s3451_s12, %s3463_s17  ;;  %814 = vperm.xlu0 %2423, %v796_v2   ;;  %824 = vperm.xlu1 %2424, %v798_v4   ;;  %v799_v8 = vld [vmem:[%s2950_s20 + $0x18] sm:$0xff]  ;;  %v802_v10 = vld [vmem:[%s2950_s20 + $0x30] sm:$0xff]  ;;  %v800_v11 = vld [vmem:[%s2950_s20 + $0x20] sm:$0xff] }
  0x85   : > { %s610_s19 = scalar_lea.vmem %s3452_s1, %s3463_s17  ;;  %748 = vmatpush.bf16.msra.mxu0 %v2967_v3  ;;  %2344 = vmatpush.bf16.msra.mxu3 %v2967_v3  ;;  %v803_v13 = vld [vmem:[%s2950_s20 + $0x38] sm:$0xff]  ;;  %v805_v15 = vld [vmem:[%s2950_s20 + $0x48] sm:$0xff]  ;;  %v806_v17 = vld [vmem:[%s2950_s20 + $0x50] sm:$0xff] }
  0x86   : > { %834 = vperm.xlu2 %2425, %v800_v11   ;;  %v808_v20 = vld [vmem:[%s2950_s20 + $0x60] sm:$0xff]  ;;  %v801_v21 = vld [vmem:[%s2950_s20 + $0x28] sm:$0xff]  ;;  %v811_v23 = vld [vmem:[%s2950_s20 + $0x78] sm:$0xff]  ;;  %s3023_s23 = scalar_lea.vmem %s3453_s16, %s2944_s24 }
  0x87   : > { %v809_v22 = vld [vmem:[%s2950_s20 + $0x68] sm:$0xff]  ;;  %v804_v24 = vld [vmem:[%s2950_s20 + $0x40] sm:$0xff]  ;;  %v807_v27 = vld [vmem:[%s2950_s20 + $0x58] sm:$0xff] }
  0x88   : > { %v810_v30 = vld [vmem:[%s2950_s20 + $0x70] sm:$0xff]  ;;  %v2267_v31 = vld [vmem:[%s2924_s11 + $0x18] sm:$0xff]  ;;  %v2268_v33 = vld [vmem:[%s2924_s11 + $0x20] sm:$0xff]  ;;  %s3455_s20 = sld [smem:[#allocation22_spill]] }
  0x89   : > { %749 = vmatpush.bf16.msra.mxu0 %v2973_v5  ;;  %2345 = vmatpush.bf16.msra.mxu3 %v2973_v5  ;;  %v2287_v32 = vld [vmem:[%s3023_s23 + $0x78] sm:$0xff]  ;;  %v2286_v34 = vld [vmem:[%s3023_s23 + $0x70] sm:$0xff]  ;;  %v2285_v35 = vld [vmem:[%s3023_s23 + $0x68] sm:$0xff] }
  0x8a   : > { %1153 = vmatpush.bf16.msra.mxu2 %v2287_v32  ;;  %v2279_v36 = vld [vmem:[%s3023_s23 + $0x38] sm:$0xff]  ;;  %v2284_v37 = vld [vmem:[%s3023_s23 + $0x60] sm:$0xff]  ;;  %v2278_v38 = vld [vmem:[%s3023_s23 + $0x30] sm:$0xff] }
  0x8b   : > { %1104 = vmatpush.bf16.msra.mxu1 %v2279_v36  ;;  %v2283_v39 = vld [vmem:[%s3023_s23 + $0x58] sm:$0xff]  ;;  %v2277_v40 = vld [vmem:[%s3023_s23 + $0x28] sm:$0xff]  ;;  %v2282_v41 = vld [vmem:[%s3023_s23 + $0x50] sm:$0xff] }
  0x8c   : > { %819 = vperm.xlu0 %2423, %v797_v6   ;;  %829 = vperm.xlu1 %2424, %v799_v8   ;;  %v2276_v42 = vld [vmem:[%s3023_s23 + $0x20] sm:$0xff]  ;;  %v2281_v43 = vld [vmem:[%s3023_s23 + $0x48] sm:$0xff]  ;;  %v2275_v44 = vld [vmem:[%s3023_s23 + $0x18] sm:$0xff] }
  0x8d   : > { %750 = vmatpush.bf16.msra.mxu0 %v2979_v7  ;;  %2346 = vmatpush.bf16.msra.mxu3 %v2979_v7  ;;  %v2280_v45 = vld [vmem:[%s3023_s23 + $0x40] sm:$0xff]  ;;  %v2274_v46 = vld [vmem:[%s3023_s23 + $0x10] sm:$0xff]  ;;  %v2273_v47 = vld [vmem:[%s3023_s23 + $0x8] sm:$0xff] }
  0x8e   : > { %839 = vperm.xlu2 %2425, %v801_v21   ;;  %1154 = vmatpush.bf16.msra.mxu2 %v2286_v34  ;;  %v2272_v48 = vld [vmem:[%s3023_s23] sm:$0xff]  ;;  %s3353_s5 = scalar_lea.vmem %s3455_s20, %s2944_s24 }
  0x8f   : > { %1105 = vmatpush.bf16.msra.mxu1 %v2278_v38 }
  0x91   : > { %751 = vmatpush.bf16.msra.mxu0 %v2985_v9  ;;  %2347 = vmatpush.bf16.msra.mxu3 %v2985_v9 }
  0x92   : > { %1155 = vmatpush.bf16.msra.mxu2 %v2285_v35 }
  0x93   : > { %1106 = vmatpush.bf16.msra.mxu1 %v2277_v40 }
  0x94   : > { %844 = vperm.xlu0 %2423, %v802_v10   ;;  %849 = vperm.xlu1 %2424, %v803_v13  }
  0x95   : > { %752 = vmatpush.bf16.msra.mxu0 %v2992_v12  ;;  %2348 = vmatpush.bf16.msra.mxu3 %v2992_v12 }
  0x96   : > { %854 = vperm.xlu2 %2425, %v804_v24   ;;  %1156 = vmatpush.bf16.msra.mxu2 %v2284_v37 }
  0x97   : > { %1107 = vmatpush.bf16.msra.mxu1 %v2276_v42 }
  0x99   : > { %753 = vmatpush.bf16.msra.mxu0 %v2998_v14  ;;  %2349 = vmatpush.bf16.msra.mxu3 %v2998_v14 }
  0x9a   : > { %1157 = vmatpush.bf16.msra.mxu2 %v2283_v39 }
  0x9b   : > { %1108 = vmatpush.bf16.msra.mxu1 %v2275_v44 }
  0x9c   : > { %859 = vperm.xlu0 %2423, %v805_v15   ;;  %864 = vperm.xlu1 %2424, %v806_v17  }
  0x9d   : > { %754 = vmatpush.bf16.msra.mxu0 %v2256_v16  ;;  %2350 = vmatpush.bf16.msra.mxu3 %v2256_v16 }
  0x9e   : > { %869 = vperm.xlu2 %2425, %v807_v27   ;;  %1158 = vmatpush.bf16.msra.mxu2 %v2282_v41 }
  0x9f   : > { %1109 = vmatpush.bf16.msra.mxu1 %v2274_v46  ;;  %v2303_v46 = vld [vmem:[%s2933_s21 + $0x74] sm:$0xf0] }
  0xa0   : > { %755 = vmatmul.bf16.vlgmr.msra.gmra.mxu0 %v2264_v18  ;;  %780 = vmatmul.bf16.vlgmr.msra.gmra.mxu3 %v2269_v19 }
  0xa2   : > { %1159 = vmatpush.bf16.msra.mxu2 %v2281_v43 }
  0xa3   : > { %1110 = vmatpush.bf16.msra.mxu1 %v2273_v47  ;;  %v2302_v47 = vld [vmem:[%s2933_s21 + $0x74] sm:$0xf] }
  0xa4   : > { %874 = vperm.xlu0 %2423, %v808_v20   ;;  %879 = vperm.xlu1 %2424, %v809_v22  }
  0xa6   : > { %884 = vperm.xlu2 %2425, %v810_v30   ;;  %1160 = vmatpush.bf16.msra.mxu2 %v2280_v45  ;;  %v2241_v45 = vld [vmem:[%s2933_s21 + $0x70] sm:$0xf] }
  0xa7   : > { %1111 = vmatpush.bf16.msra.mxu1 %v2272_v48 }
  0xa9   : > { %1161 = vmatmul.bf16.vlgmr.msra.gmra.mxu2 %v2256_v16 }
  0xac   : > { %889 = vperm.xlu0 %2423, %v811_v23  }
  0xb0   : > { %760 = vmatmul.bf16.gmra.mxu0 %v2265_v25  ;;  %785 = vmatmul.bf16.gmra.mxu3 %v2270_v26 }
  0xb9   : > { %1166 = vmatmul.bf16.gmra.mxu2 %v2998_v14 }
  0xc0   : > { %765 = vmatmul.bf16.gmra.mxu0 %v2266_v28  ;;  %790 = vmatmul.bf16.gmra.mxu3 %v2271_v29 }
  0xc9   : > { %1171 = vmatmul.bf16.gmra.mxu2 %v2992_v12 }
  0xd0   : > { %770 = vmatmul.bf16.gmra.mxu0 %v2267_v31 }
  0xd9   : > { %1176 = vmatmul.bf16.gmra.mxu2 %v2985_v9 }
  0xe0   : > { %775 = vmatmul.bf16.gmra.mxu0 %v2268_v33  ;;  %v835_v11 = vpop.permute.xlu2 %834 }
  0xe8   : > { %v840_v15 = vpop.permute.xlu2 %839 }
  0xe9   : > { %1181 = vmatmul.bf16.gmra.mxu2 %v2979_v7 }
  0xf0   : > { %v855_v34 = vpop.permute.xlu2 %854 }
  0xf6   : > { %v815_v49 = vpop.permute.xlu0 %814  ;;  %v825_v59 = vpop.permute.xlu1 %824 }
  0xf8   : > { %v870_v44 = vpop.permute.xlu2 %869 }
  0xf9   : > { %1186 = vmatmul.bf16.gmra.mxu2 %v2973_v5 }
  0xfe   : > { %v820_v52 = vpop.permute.xlu0 %819  ;;  %v830_v63 = vpop.permute.xlu1 %829 }
 0x106   : > { %v845_v23 = vpop.permute.xlu0 %844  ;;  %v850_v25 = vpop.permute.xlu1 %849 }
 0x109   : > { %1191 = vmatmul.bf16.gmra.mxu2 %v2967_v3  ;;  %v2242_v3 = vor.u32 %v2303_v46, %v2241_v45  ;;  %v2195_v46 = vld [vmem:[%s2933_s21 + $0x18] sm:$0xf0] }
 0x10b   : > { %1306 = vmatpush.bf16.msrb.mxu3 %v2242_v3  ;;  %v2185_v3 = vld [vmem:[%s2933_s21] sm:$0xf] }
 0x10e   : > { %v860_v36 = vpop.permute.xlu0 %859  ;;  %v865_v48 = vpop.permute.xlu1 %864 }
 0x119   : > { %1196 = vmatmul.bf16.gmra.mxu2 %v2957_v1 }
 0x11d   : > { %v756_v50 = vpop.f32.mrf.mxu0 }
 0x11e   : > { %v892_v51 = vmul.f32 %v815_v49, %v756_v50  ;;  %v2243_v50 = vld [vmem:[%s2933_s21 + $0x78] sm:$0xf0] }
 0x120   : > { %v908_v54 = vpack.c.bf16 %v892_v51, %v892_v51 }
 0x122   : > { %v940_v57 = vunpack.c.l.b16 %v908_v54 }
 0x123   : > { %v781_v31 = vpop.f32.mrf.mxu3 }
 0x124   : > { %v902_v51 = vmul.f32 %v865_v48, %v781_v31 }
 0x125   : > { %v758_v53 = vpop.f32.mrf.mxu0 }
 0x126   : > { %v893_v55 = vmul.f32 %v820_v52, %v758_v53  ;;  %v2246_v53 = vor.u32 %v2302_v47, %v2243_v50  ;;  %v918_v54 = vpack.c.bf16 %v902_v51, %v902_v51  ;;  %v2289_v50 = vld [vmem:[%s2933_s21 + $0x4] sm:$0xf0]  ;;  %v2288_v51 = vld [vmem:[%s2933_s21 + $0x4] sm:$0xf] }
 0x128   : > { %v909_v56 = vpack.c.bf16 %v893_v55, %v893_v55  ;;  %1355 = vmatpush.bf16.msrb.mxu0 %v2246_v53  ;;  %v2187_v53 = vld [vmem:[%s2933_s21 + $0x8] sm:$0xf0] }
 0x12a   : > { %v941_v58 = vunpack.c.l.b16 %v909_v56  ;;  %v950_v56 = vunpack.c.l.b16 %v918_v54 }
 0x12b   : > { %v783_v5 = vpop.f32.mrf.mxu3 }
 0x12c   : > { %v956_v60 = vpack.c.b16 %v941_v58, %v940_v57  ;;  %v903_v52 = vmul.f32 %v870_v44, %v783_v5  ;;  %v2203_v5 = vld [vmem:[%s2933_s21 + $0x28] sm:$0xf0]  ;;  %v885_v44 = vpop.permute.xlu2 %884 }
 0x12d   : > { %v761_v61 = vpop.f32.mrf.mxu0 }
 0x12e   : > { %1112 = vmatmul.bf16.vlgmr.msra.gmra.mxu1 %v956_v60  ;;  %v894_v62 = vmul.f32 %v825_v59, %v761_v61  ;;  %v919_v55 = vpack.c.bf16 %v903_v52, %v903_v52  ;;  %v2233_v60 = vld [vmem:[%s2933_s21 + $0x60] sm:$0xf]  ;;  %v2301_v61 = vld [vmem:[%s2933_s21 + $0x64] sm:$0xf0]  ;;  %v2186_v52 = vor.u32 %v2289_v50, %v2185_v3 }
 0x130   : > { %v910_v2 = vpack.c.bf16 %v894_v62, %v894_v62  ;;  %v951_v57 = vunpack.c.l.b16 %v919_v55  ;;  %v2300_v62 = vld [vmem:[%s2933_s21 + $0x64] sm:$0xf]  ;;  %v2190_v55 = vor.u32 %v2288_v51, %v2187_v53 }
 0x132   : > { %v942_v8 = vunpack.c.l.b16 %v910_v2  ;;  %v961_v59 = vpack.c.b16 %v951_v57, %v950_v56  ;;  %v2225_v2 = vld [vmem:[%s2933_s21 + $0x50] sm:$0xf] }
 0x133   : > { %v786_v49 = vpop.f32.mrf.mxu3 }
 0x135   : > { %v763_v0 = vpop.f32.mrf.mxu0 }
 0x136   : > { %v895_v4 = vmul.f32 %v830_v63, %v763_v0  ;;  %v2234_v63 = vor.u32 %v2301_v61, %v2233_v60  ;;  %v2235_v0 = vld [vmem:[%s2933_s21 + $0x68] sm:$0xf0] }
 0x137   : > { %v2238_v1 = vor.u32 %v2300_v62, %v2235_v0 }
 0x138   : > { %v911_v6 = vpack.c.bf16 %v895_v4, %v895_v4  ;;  %v2299_v4 = vld [vmem:[%s2933_s21 + $0x54] sm:$0xf0]  ;;  %1307 = vmatpush.bf16.msrb.mxu3 %v2234_v63  ;;  %v3086_v63 = vld [vmem:[%s607_s30] ss:$0 sm:$0xff] }
 0x139   : > { %1356 = vmatpush.bf16.msrb.mxu0 %v2238_v1 }
 0x13a   : > { %v943_v10 = vunpack.c.l.b16 %v911_v6  ;;  %v2298_v6 = vld [vmem:[%s2933_s21 + $0x54] sm:$0xf] }
 0x13b   : > { %v788_v58 = vpop.f32.mrf.mxu3 }
 0x13c   : > { %v957_v12 = vpack.c.b16 %v943_v10, %v942_v8  ;;  %v880_v8 = vpop.permute.xlu1 %879  ;;  %v2226_v10 = vor.u32 %v2299_v4, %v2225_v2 }
 0x13d   : > { %v766_v13 = vpop.f32.mrf.mxu0 }
 0x13e   : > { %1117 = vmatmul.bf16.gmra.mxu1 %v957_v12  ;;  %v896_v14 = vmul.f32 %v835_v11, %v766_v13  ;;  %v2227_v11 = vld [vmem:[%s2933_s21 + $0x58] sm:$0xf0]  ;;  %v905_v12 = vmul.f32 %v880_v8, %v788_v58  ;;  %1308 = vmatpush.bf16.msrb.mxu3 %v2226_v10 }
 0x13f   : > { %v2230_v13 = vor.u32 %v2298_v6, %v2227_v11 }
 0x140   : > { %v912_v17 = vpack.c.bf16 %v896_v14, %v896_v14  ;;  %v2217_v14 = vld [vmem:[%s2933_s21 + $0x40] sm:$0xf] }
 0x141   : > { %1357 = vmatpush.bf16.msrb.mxu0 %v2230_v13 }
 0x142   : > { %v944_v9 = vunpack.c.l.b16 %v912_v17  ;;  %v2296_v17 = vld [vmem:[%s2933_s21 + $0x44] sm:$0xf] }
 0x145   : > { %v768_v16 = vpop.f32.mrf.mxu0 }
 0x146   : > { %v897_v18 = vmul.f32 %v840_v15, %v768_v16  ;;  %v2297_v15 = vld [vmem:[%s2933_s21 + $0x44] sm:$0xf0]  ;;  %v875_v16 = vpop.permute.xlu0 %874 }
 0x148   : > { %v913_v19 = vpack.c.bf16 %v897_v18, %v897_v18  ;;  %v2219_v18 = vld [vmem:[%s2933_s21 + $0x48] sm:$0xf0] }
 0x14a   : > { %v945_v20 = vunpack.c.l.b16 %v913_v19  ;;  %v904_v19 = vmul.f32 %v875_v16, %v786_v49 }
 0x14c   : > { %v958_v21 = vpack.c.b16 %v945_v20, %v944_v9  ;;  %v791_v9 = vpop.f32.mrf.mxu3  ;;  %v2218_v20 = vor.u32 %v2297_v15, %v2217_v14 }
 0x14d   : > { %v771_v22 = vpop.f32.mrf.mxu0  ;;  %v906_v47 = vmul.f32 %v885_v44, %v791_v9 }
 0x14e   : > { %1122 = vmatmul.bf16.gmra.mxu1 %v958_v21  ;;  %v898_v24 = vmul.f32 %v845_v23, %v771_v22  ;;  %v921_v21 = vpack.c.bf16 %v905_v12, %v905_v12  ;;  %v2222_v22 = vor.u32 %v2296_v17, %v2219_v18  ;;  %v920_v23 = vpack.c.bf16 %v904_v19, %v904_v19 }
 0x14f   : > { %1309 = vmatpush.bf16.msrb.mxu3 %v2218_v20  ;;  %v922_v54 = vpack.c.bf16 %v906_v47, %v906_v47 }
 0x150   : > { %v914_v27 = vpack.c.bf16 %v898_v24, %v898_v24  ;;  %v953_v24 = vunpack.c.l.b16 %v921_v21  ;;  %1358 = vmatpush.bf16.msrb.mxu0 %v2222_v22 }
 0x151   : > { %v954_v58 = vunpack.c.l.b16 %v922_v54 }
 0x152   : > { %v946_v7 = vunpack.c.l.b16 %v914_v27  ;;  %v2294_v27 = vld [vmem:[%s2933_s21 + $0x34] sm:$0xf] }
 0x155   : > { %v773_v26 = vpop.f32.mrf.mxu0 }
 0x156   : > { %v899_v28 = vmul.f32 %v850_v25, %v773_v26  ;;  %v2209_v25 = vld [vmem:[%s2933_s21 + $0x30] sm:$0xf]  ;;  %v2295_v26 = vld [vmem:[%s2933_s21 + $0x34] sm:$0xf0] }
 0x158   : > { %v915_v29 = vpack.c.bf16 %v899_v28, %v899_v28  ;;  %v2210_v28 = vor.u32 %v2295_v26, %v2209_v25 }
 0x15a   : > { %v947_v30 = vunpack.c.l.b16 %v915_v29  ;;  %v2211_v29 = vld [vmem:[%s2933_s21 + $0x38] sm:$0xf0]  ;;  %1310 = vmatpush.bf16.msrb.mxu3 %v2210_v28 }
 0x15c   : > { %v959_v32 = vpack.c.b16 %v947_v30, %v946_v7  ;;  %v952_v7 = vunpack.c.l.b16 %v920_v23  ;;  %v2214_v30 = vor.u32 %v2294_v27, %v2211_v29  ;;  %v3127_v29 = vld [vmem:[%s610_s19] ss:$0 sm:$0xff] }
 0x15d   : > { %v776_v33 = vpop.f32.mrf.mxu0 }
 0x15e   : > { %1127 = vmatmul.bf16.gmra.mxu1 %v959_v32  ;;  %v900_v35 = vmul.f32 %v855_v34, %v776_v33  ;;  %v962_v31 = vpack.c.b16 %v953_v24, %v952_v7  ;;  %1359 = vmatpush.bf16.msrb.mxu0 %v2214_v30  ;;  %v2201_v32 = vld [vmem:[%s2933_s21 + $0x20] sm:$0xf]  ;;  %v2293_v33 = vld [vmem:[%s2933_s21 + $0x24] sm:$0xf0]  ;;  %v2292_v34 = vld [vmem:[%s2933_s21 + $0x24] sm:$0xf] }
 0x160   : > { %v916_v38 = vpack.c.bf16 %v900_v35, %v900_v35  ;;  %v793_v35 = vpop.f32.mrf.mxu3 }
 0x162   : > { %v948_v41 = vunpack.c.l.b16 %v916_v38  ;;  %v890_v38 = vpop.permute.xlu0 %889 }
 0x165   : > { %v778_v37 = vpop.f32.mrf.mxu0 }
 0x166   : > { %v901_v39 = vmul.f32 %v860_v36, %v778_v37  ;;  %v2202_v36 = vor.u32 %v2293_v33, %v2201_v32  ;;  %v2206_v37 = vor.u32 %v2292_v34, %v2203_v5 }
 0x168   : > { %v917_v40 = vpack.c.bf16 %v901_v39, %v901_v39  ;;  %v1162_v39 = vpop.f32.mrf.mxu2  ;;  %1311 = vmatpush.bf16.msrb.mxu3 %v2202_v36  ;;  %1360 = vmatpush.bf16.msrb.mxu0 %v2206_v37 }
 0x16a   : > { %v949_v42 = vunpack.c.l.b16 %v917_v40  ;;  %v907_v40 = vmul.f32 %v890_v38, %v793_v35 }
 0x16c   : > { %v960_v43 = vpack.c.b16 %v949_v42, %v948_v41  ;;  %v2193_v41 = vld [vmem:[%s2933_s21 + $0x10] sm:$0xf]  ;;  %v2291_v42 = vld [vmem:[%s2933_s21 + $0x14] sm:$0xf0]  ;;  %v923_v49 = vpack.c.bf16 %v907_v40, %v907_v40 }
 0x16d   : > { %v2194_v45 = vor.u32 %v2291_v42, %v2193_v41 }
 0x16e   : > { %1132 = vmatmul.bf16.gmra.mxu1 %v960_v43  ;;  %v2290_v43 = vld [vmem:[%s2933_s21 + $0x14] sm:$0xf]  ;;  %v955_v56 = vunpack.c.l.b16 %v923_v49  ;;  %s3454_s21 = sld [smem:[#allocation21_spill]] }
 0x16f   : > { %v2198_v48 = vor.u32 %v2290_v43, %v2195_v46  ;;  %1312 = vmatpush.bf16.msrb.mxu3 %v2194_v45 }
 0x170   : > { %v1164_v57 = vpop.f32.mrf.mxu2 }
 0x171   : > { %1361 = vmatpush.bf16.msrb.mxu0 %v2198_v48 }
 0x173   : > { %1313 = vmatpush.bf16.msrb.mxu3 %v2186_v52 }
 0x174   : > { %s613_s22 = scalar_lea.vmem %s3454_s21, %s3463_s17  ;;  %s519_s17 = scalar_lea.vmem [#allocation9], %s2913_s15 }
 0x175   : > { %1362 = vmatpush.bf16.msrb.mxu0 %v2190_v55 }
 0x178   : > { %v1167_v60 = vpop.f32.mrf.mxu2 }
 0x17e   : > { %1137 = vmatmul.bf16.gmra.mxu1 %v961_v59  ;;  %v963_v59 = vpack.c.b16 %v955_v56, %v954_v58 }
 0x180   : > { %v1169_v62 = vpop.f32.mrf.mxu2 }
 0x188   : > { %v1172_v8 = vpop.f32.mrf.mxu2 }
 0x18e   : > { %1142 = vmatmul.bf16.gmra.mxu1 %v962_v31 }
 0x190   : > { %v1174_v12 = vpop.f32.mrf.mxu2 }
 0x198   : > { %v1177_v9 = vpop.f32.mrf.mxu2 }
 0x19e   : > { %1147 = vmatmul.bf16.gmra.mxu1 %v963_v59 }
 0x1a0   : > { %v1179_v23 = vpop.f32.mrf.mxu2 }
 0x1a8   : > { %v1182_v30 = vpop.f32.mrf.mxu2 }
 0x1ab   : > { %v1113_v61 = vpop.f32.mrf.mxu1 }
 0x1ac   : > { %v1114_v0 = vadd.f32 %v3086_v63, %v1113_v61 }
 0x1ae   : > { %v1163_v4 = vadd.f32 %v1162_v39, %v1114_v0 }
 0x1b0   : > { %v1184_v5 = vpop.f32.mrf.mxu2  ;;  %v1408_v46 = vmul.f32 %v3127_v29, %v1163_v4 }
 0x1b3   : > { %v1115_v1 = vpop.f32.mrf.mxu1 }
 0x1b4   : > { %v1116_v2 = vadd.f32 %v3086_v63, %v1115_v1 }
 0x1b6   : > { %v3090_v6 = vadd.f32 %v1164_v57, %v1116_v2 }
 0x1b8   : > { %v3093_v10 = vpack.c.bf16 %v3090_v6, %v1163_v4  ;;  %v1187_v42 = vpop.f32.mrf.mxu2  ;;  %v1409_v56 = vmul.f32 %v3127_v29, %v3090_v6 }
 0x1ba   : > { %1314 = vmatmul.bf16.vlgmr.msrb.gmra.mxu3 %v3093_v10  ;;  %1363 = vmatmul.bf16.vlgmr.msrb.gmra.mxu0 %v3093_v10 }
 0x1bb   : > { %v1118_v11 = vpop.f32.mrf.mxu1 }
 0x1bc   : > { %v1119_v13 = vadd.f32 %v3086_v63, %v1118_v11 }
 0x1be   : > { %v3099_v16 = vadd.f32 %v1167_v60, %v1119_v13 }
 0x1c0   : > { %v1189_v3 = vpop.f32.mrf.mxu2 }
 0x1c3   : > { %v1120_v14 = vpop.f32.mrf.mxu1 }
 0x1c4   : > { %v1121_v15 = vadd.f32 %v3086_v63, %v1120_v14 }
 0x1c6   : > { %v3101_v17 = vadd.f32 %v1169_v62, %v1121_v15 }
 0x1c8   : > { %v3105_v18 = vpack.c.bf16 %v3101_v17, %v3099_v16  ;;  %v1192_v55 = vpop.f32.mrf.mxu2  ;;  %v1411_v6 = vmul.f32 %v3127_v29, %v3101_v17 }
 0x1ca   : > { %1319 = vmatmul.bf16.gmra.mxu3 %v3105_v18  ;;  %1368 = vmatmul.bf16.gmra.mxu0 %v3105_v18 }
 0x1cb   : > { %v1123_v19 = vpop.f32.mrf.mxu1 }
 0x1cc   : > { %v1124_v20 = vadd.f32 %v3086_v63, %v1123_v19 }
 0x1ce   : > { %v3111_v24 = vadd.f32 %v1172_v8, %v1124_v20 }
 0x1d0   : > { %v1194_v0 = vpop.f32.mrf.mxu2 }
 0x1d3   : > { %v1125_v21 = vpop.f32.mrf.mxu1 }
 0x1d4   : > { %v1126_v22 = vadd.f32 %v3086_v63, %v1125_v21 }
 0x1d6   : > { %v3113_v25 = vadd.f32 %v1174_v12, %v1126_v22 }
 0x1d8   : > { %v3117_v26 = vpack.c.bf16 %v3113_v25, %v3111_v24  ;;  %v1197_v11 = vpop.f32.mrf.mxu2  ;;  %v1413_v22 = vmul.f32 %v3127_v29, %v3113_v25 }
 0x1da   : > { %1324 = vmatmul.bf16.gmra.mxu3 %v3117_v26  ;;  %1373 = vmatmul.bf16.gmra.mxu0 %v3117_v26 }
 0x1db   : > { %v1128_v27 = vpop.f32.mrf.mxu1 }
 0x1dc   : > { %v1129_v28 = vadd.f32 %v3086_v63, %v1128_v27 }
 0x1de   : > { %v1178_v7 = vadd.f32 %v1177_v9, %v1129_v28 }
 0x1e0   : > { %v1414_v31 = vmul.f32 %v3127_v29, %v1178_v7  ;;  %v1199_v20 = vpop.f32.mrf.mxu2 }
 0x1e2   : > { %1436 = vadd.xlane.f32.xlu1 %v1414_v31  ;;  %v1456_v31 = vld [vmem:[%s613_s22] sm:$0x1] }
 0x1e3   : > { %v1130_v32 = vpop.f32.mrf.mxu1 }
 0x1e4   : > { %v1131_v33 = vadd.f32 %v3086_v63, %v1130_v32 }
 0x1e6   : > { %v1180_v34 = vadd.f32 %v1179_v23, %v1131_v33  ;;  %v1457_v33 = vpack.c.bf16 %v1456_v31, %v1456_v31 }
 0x1e8   : > { %v1415_v35 = vmul.f32 %v3127_v29, %v1180_v34  ;;  %v3132_v36 = vpack.c.bf16 %v1180_v34, %v1178_v7 }
 0x1ea   : > { %1438 = vadd.xlane.f32.xlu2 %v1415_v35  ;;  %1329 = vmatmul.bf16.gmra.mxu3 %v3132_v36 }
 0x1eb   : > { %1378 = vmatmul.bf16.gmra.mxu0 %v3132_v36  ;;  %v1133_v37 = vpop.f32.mrf.mxu1 }
 0x1ec   : > { %v1134_v38 = vadd.f32 %v3086_v63, %v1133_v37 }
 0x1ee   : > { %v1183_v39 = vadd.f32 %v1182_v30, %v1134_v38 }
 0x1f0   : > { %v1416_v40 = vmul.f32 %v3127_v29, %v1183_v39 }
 0x1f2   : > { %1440 = vadd.xlane.f32.xlu0 %v1416_v40 }
 0x1f3   : > { %v1135_v41 = vpop.f32.mrf.mxu1 }
 0x1f4   : > { %v1136_v43 = vadd.f32 %v3086_v63, %v1135_v41 }
 0x1f6   : > { %v1185_v44 = vadd.f32 %v1184_v5, %v1136_v43 }
 0x1f8   : > { %v1417_v45 = vmul.f32 %v3127_v29, %v1185_v44  ;;  %v1206_v47 = vpack.c.bf16 %v1185_v44, %v1183_v39 }
 0x1fa   : > { %1442 = vadd.xlane.f32.xlu2 %v1417_v45  ;;  %1424 = vadd.xlane.f32.xlu0 %v1408_v46 }
 0x1fb   : > { %1334 = vmatmul.bf16.gmra.mxu3 %v1206_v47  ;;  %1383 = vmatmul.bf16.gmra.mxu0 %v1206_v47  ;;  %v1138_v48 = vpop.f32.mrf.mxu1 }
 0x1fc   : > { %v1139_v49 = vadd.f32 %v3086_v63, %v1138_v48 }
 0x1fe   : > { %v1188_v50 = vadd.f32 %v1187_v42, %v1139_v49 }
 0x200   : > { %v1418_v51 = vmul.f32 %v3127_v29, %v1188_v50 }
 0x202   : > { %1444 = vadd.xlane.f32.xlu1 %v1418_v51 }
 0x203   : > { %v1140_v52 = vpop.f32.mrf.mxu1 }
 0x204   : > { %v1141_v53 = vadd.f32 %v3086_v63, %v1140_v52 }
 0x206   : > { %v1190_v54 = vadd.f32 %v1189_v3, %v1141_v53  ;;  %v2338_v3 = vld [vmem:[%s2931_s13 + $0x18] sm:$0xff]  }
 0x208   : > { %v1419_v57 = vmul.f32 %v3127_v29, %v1190_v54  ;;  %v1207_v58 = vpack.c.bf16 %v1190_v54, %v1188_v50  ;;  %v3175_v50 = vld [vmem:[%s2931_s13] sm:$0xff]  }
 0x20a   : > { %1426 = vadd.xlane.f32.xlu1 %v1409_v56  ;;  %1446 = vadd.xlane.f32.xlu2 %v1419_v57  ;;  %v2319_v56 = vunpack.c.h.bf16 %v2338_v3  ;;  %v2318_v57 = vunpack.c.l.bf16 %v2338_v3 }
 0x20b   : > { %1339 = vmatmul.bf16.gmra.mxu3 %v1207_v58  ;;  %1388 = vmatmul.bf16.gmra.mxu0 %v1207_v58  ;;  %v1143_v59 = vpop.f32.mrf.mxu1 }
 0x20c   : > { %v1144_v60 = vadd.f32 %v3086_v63, %v1143_v59 }
 0x20e   : > { %v1193_v61 = vadd.f32 %v1192_v55, %v1144_v60 }
 0x210   : > { %v1420_v62 = vmul.f32 %v3127_v29, %v1193_v61 }
 0x212   : > { %1448 = vadd.xlane.f32.xlu1 %v1420_v62 }
 0x213   : > { %v1145_v1 = vpop.f32.mrf.mxu1 }
 0x214   : > { %v1146_v2 = vadd.f32 %v3086_v63, %v1145_v1 }
 0x216   : > { %v3150_v4 = vadd.f32 %v1194_v0, %v1146_v2 }
 0x218   : > { %v1208_v8 = vpack.c.bf16 %v3150_v4, %v1193_v61 }
 0x21a   : > { %1430 = vadd.xlane.f32.xlu1 %v1411_v6 }
 0x21b   : > { %1344 = vmatmul.bf16.gmra.mxu3 %v1208_v8  ;;  %1393 = vmatmul.bf16.gmra.mxu0 %v1208_v8  ;;  %v1148_v12 = vpop.f32.mrf.mxu1 }
 0x21c   : > { %v1149_v13 = vadd.f32 %v3086_v63, %v1148_v12 }
 0x21e   : > { %v1198_v14 = vadd.f32 %v1197_v11, %v1149_v13 }
 0x220   : > { %v1422_v15 = vmul.f32 %v3127_v29, %v1198_v14 }
 0x222   : > { %1452 = vadd.xlane.f32.xlu1 %v1422_v15 }
 0x223   : > { %v1150_v19 = vpop.f32.mrf.mxu1 }
 0x224   : > { %v1151_v9 = vadd.f32 %v3086_v63, %v1150_v19  ;;  %v1410_v19 = vmul.f32 %v3127_v29, %v3099_v16 }
 0x226   : > { %v3158_v21 = vadd.f32 %v1199_v20, %v1151_v9  ;;  %v1421_v9 = vmul.f32 %v3127_v29, %v3150_v4 }
 0x228   : > { %v1209_v17 = vpack.c.bf16 %v3158_v21, %v1198_v14 }
 0x22a   : > { %1458 = vmatpush.bf16.xpose.msrb.mxu1 %v1209_v17  ;;  %1434 = vadd.xlane.f32.xlu1 %v1413_v22 }
 0x22b   : > { %1349 = vmatmul.bf16.gmra.mxu3 %v1209_v17  ;;  %1398 = vmatmul.bf16.gmra.mxu0 %v1209_v17  ;;  %v2339_v17 = vld [vmem:[%s2931_s13 + $0x20] sm:$0xff]  }
 0x232   : > { %1459 = vmatpush.bf16.xpose.msrb.mxu1 %v1208_v8 }
 0x23a   : > { %1460 = vmatpush.bf16.xpose.msrb.mxu1 %v1207_v58  ;;  %v2306_v58 = vunpack.c.l.bf16 %v3175_v50 }
 0x23d   : > { %v1315_v23 = vpop.f32.mrf.mxu3 }
 0x242   : > { %1461 = vmatpush.bf16.xpose.msrb.mxu1 %v1206_v47 }
 0x245   : > { %v1317_v27 = vpop.f32.mrf.mxu3 }
 0x246   : > { %v1736_v28 = vpack.c.bf16 %v1317_v27, %v1315_v23  ;;  %v2323_v23 = vunpack.c.h.bf16 %v2339_v17  ;;  %v2322_v27 = vunpack.c.l.bf16 %v2339_v17 }
 0x24a   : > { %1462 = vmatpush.bf16.xpose.msrb.mxu1 %v3132_v36 }
 0x24d   : > { %v1320_v63 = vpop.f32.mrf.mxu3 }
 0x252   : > { %1463 = vmatpush.bf16.xpose.msrb.mxu1 %v3117_v26 }
 0x255   : > { %v1322_v7 = vpop.f32.mrf.mxu3  ;;  %v1437_v48 = vpop.xlane.xlu1 %1436 }
 0x256   : > { %v1737_v30 = vpack.c.bf16 %v1322_v7, %v1320_v63 }
 0x25a   : > { %1464 = vmatpush.bf16.xpose.msrb.mxu1 %v3105_v18 }
 0x25d   : > { %v1325_v25 = vpop.f32.mrf.mxu3  ;;  %v1439_v51 = vpop.xlane.xlu2 %1438 }
 0x262   : > { %1465 = vmatpush.bf16.xpose.msrb.mxu1 %v3093_v10 }
 0x265   : > { %v1327_v32 = vpop.f32.mrf.mxu3  ;;  %v1441_v46 = vpop.xlane.xlu0 %1440 }
 0x266   : > { %v1738_v34 = vpack.c.bf16 %v1327_v32, %v1325_v25  ;;  %v1412_v32 = vmul.f32 %v3127_v29, %v3111_v24 }
 0x269   : > { %1466 = vmatmul.bf16.vlgmr.msrb.gmra.mxu1 %v1457_v33  ;;  %v1423_v33 = vmul.f32 %v3127_v29, %v3158_v21 }
 0x26d   : > { %v1330_v35 = vpop.f32.mrf.mxu3  ;;  %v1425_v52 = vpop.xlane.xlu0 %1424 }
 0x26e   : > { %v1443_v12 = vpop.xlane.xlu2 %1442 }
 0x275   : > { %v1332_v36 = vpop.f32.mrf.mxu3  ;;  %v1445_v15 = vpop.xlane.xlu1 %1444 }
 0x276   : > { %v1739_v5 = vpack.c.bf16 %v1332_v36, %v1330_v35  ;;  %v2340_v35 = vld [vmem:[%s2931_s13 + $0x28] sm:$0xff]  }
 0x27d   : > { %v1427_v16 = vpop.xlane.xlu1 %1426  ;;  %v1447_v4 = vpop.xlane.xlu2 %1446 }
 0x27e   : > { %v1335_v26 = vpop.f32.mrf.mxu3 }
 0x286   : > { %v1337_v37 = vpop.f32.mrf.mxu3 }
 0x287   : > { %v1740_v45 = vpack.c.bf16 %v1337_v37, %v1335_v26  ;;  %v2327_v26 = vunpack.c.h.bf16 %v2340_v35  ;;  %v2326_v37 = vunpack.c.l.bf16 %v2340_v35 }
 0x28e   : > { %v1340_v38 = vpop.f32.mrf.mxu3 }
 0x296   : > { %v1342_v39 = vpop.f32.mrf.mxu3 }
 0x297   : > { %v1741_v44 = vpack.c.bf16 %v1342_v39, %v1340_v38 }
 0x29e   : > { %v1345_v18 = vpop.f32.mrf.mxu3 }
 0x2a6   : > { %v1347_v40 = vpop.f32.mrf.mxu3 }
 0x2a7   : > { %v1742_v10 = vpack.c.bf16 %v1347_v40, %v1345_v18 }
 0x2ae   : > { %v1350_v41 = vpop.f32.mrf.mxu3 }
 0x2b6   : > { %v1352_v42 = vpop.f32.mrf.mxu3 }
 0x2b7   : > { %v1743_v43 = vpack.c.bf16 %v1352_v42, %v1350_v41  ;;  %v2341_v41 = vld [vmem:[%s2931_s13 + $0x30] sm:$0xff]  }
 0x2b9   : > { %1748 = vmatpush.bf16.msra.mxu1 %v1743_v43  ;;  %2351 = vmatpush.bf16.msrb.mxu2 %v1743_v43  ;;  %v2330_v43 = vunpack.c.l.bf16 %v2341_v41 }
 0x2bd   : > { %1749 = vmatpush.bf16.msra.mxu1 %v1742_v10  ;;  %2352 = vmatpush.bf16.msrb.mxu2 %v1742_v10  ;;  %v2307_v10 = vunpack.c.h.bf16 %v3175_v50 }
 0x2c1   : > { %1750 = vmatpush.bf16.msra.mxu1 %v1741_v44  ;;  %2353 = vmatpush.bf16.msrb.mxu2 %v1741_v44 }
 0x2c5   : > { %1751 = vmatpush.bf16.msra.mxu1 %v1740_v45  ;;  %2354 = vmatpush.bf16.msrb.mxu2 %v1740_v45 }
 0x2c9   : > { %1752 = vmatpush.bf16.msra.mxu1 %v1739_v5  ;;  %2355 = vmatpush.bf16.msrb.mxu2 %v1739_v5  ;;  %v1449_v5 = vpop.xlane.xlu1 %1448 }
 0x2cd   : > { %1753 = vmatpush.bf16.msra.mxu1 %v1738_v34  ;;  %2356 = vmatpush.bf16.msrb.mxu2 %v1738_v34 }
 0x2d1   : > { %1754 = vmatpush.bf16.msra.mxu1 %v1737_v30  ;;  %2357 = vmatpush.bf16.msrb.mxu2 %v1737_v30 }
 0x2d5   : > { %1755 = vmatpush.bf16.msra.mxu1 %v1736_v28  ;;  %2358 = vmatpush.bf16.msrb.mxu2 %v1736_v28 }
 0x2e6   : > { %v1467_v47 = vpop.f32.mrf.mxu1 }
 0x2e7   : > { %v3171_v49 = vperm.slane %v1467_v47, 0 }
 0x2e9   : > { %v1479_v53 = vadd.f32 %v3171_v49, %v1439_v51  ;;  %v1478_v54 = vadd.f32 %v3171_v49, %v1437_v48  ;;  %v1472_v55 = vadd.f32 %v3171_v49, %v1425_v52  ;;  %v1481_v13 = vadd.f32 %v3171_v49, %v1443_v12  ;;  %v1431_v48 = vpop.xlane.xlu1 %1430 }
 0x2ea   : > { %v1480_v14 = vadd.f32 %v3171_v49, %v1441_v46  ;;  %v1483_v25 = vadd.f32 %v3171_v49, %v1447_v4  ;;  %v1482_v31 = vadd.f32 %v3171_v49, %v1445_v15  ;;  %v1484_v18 = vadd.f32 %v3171_v49, %v1449_v5 }
 0x2eb   : > { %vm1495_vm0 = vcmp.gt.f32.partialorder %v1479_v53, 0.0  ;;  %v1511_v59 = vmul.f32 0.2, %v1479_v53  ;;  %vm1494_vm1 = vcmp.gt.f32.partialorder %v1478_v54, 0.0  ;;  %v1510_v60 = vmul.f32 0.2, %v1478_v54 }
 0x2ec   : > { %vm1488_vm2 = vcmp.gt.f32.partialorder %v1472_v55, 0.0  ;;  %v1504_v61 = vmul.f32 0.2, %v1472_v55  ;;  %v1513_v20 = vmul.f32 0.2, %v1481_v13  ;;  %vm1497_vm3 = vcmp.gt.f32.partialorder %v1481_v13, 0.0 }
 0x2ed   : > { %v1527_v62 = vsel %vm1495_vm0, %v1479_v53, %v1511_v59  ;;  %v1526_v0 = vsel %vm1494_vm1, %v1478_v54, %v1510_v60  ;;  %v1512_v22 = vmul.f32 0.2, %v1480_v14  ;;  %vm1496_vm4 = vcmp.gt.f32.partialorder %v1480_v14, 0.0 }
 0x2ee   : > { %v3181_v1 = vadd.f32 %v2319_v56, %v1527_v62  ;;  %v3183_v2 = vadd.f32 %v2318_v57, %v1526_v0  ;;  %v1520_v6 = vsel %vm1488_vm2, %v1472_v55, %v1504_v61  ;;  %v1469_v8 = vpop.f32.mrf.mxu1  ;;  %v1529_v28 = vsel %vm1497_vm3, %v1481_v13, %v1513_v20  ;;  %v2336_v13 = vld [vmem:[%s2931_s13 + $0x8] sm:$0xff]  }
 0x2ef   : > { %v3185_v11 = vadd.f32 %v2306_v58, %v1520_v6  ;;  %v1528_v63 = vsel %vm1496_vm4, %v1480_v14, %v1512_v22  ;;  %v3197_v7 = vadd.f32 %v2323_v23, %v1529_v28  ;;  %v1515_v34 = vmul.f32 0.2, %v1483_v25  ;;  %v2342_v6 = vld [vmem:[%s2931_s13 + $0x38] sm:$0xff]  }
 0x2f0   : > { %1598 = vmax.xlane.f32.xlu0 %v3181_v1  ;;  %1596 = vmax.xlane.f32.xlu2 %v3183_v2  ;;  %v3199_v30 = vadd.f32 %v2322_v27, %v1528_v63  ;;  %v1514_v36 = vmul.f32 0.2, %v1482_v31  ;;  %vm1499_vm5 = vcmp.gt.f32.partialorder %v1483_v25, 0.0  ;;  %vm1498_vm6 = vcmp.gt.f32.partialorder %v1482_v31, 0.0 }
 0x2f1   : > { %1584 = vmax.xlane.f32.xlu1 %v3185_v11  ;;  %v1531_v38 = vsel %vm1499_vm5, %v1483_v25, %v1515_v34  ;;  %v1473_v24 = vadd.f32 %v3171_v49, %v1427_v16  ;;  %v1516_v21 = vmul.f32 0.2, %v1484_v18  ;;  %vm1500_vm7 = vcmp.gt.f32.partialorder %v1484_v18, 0.0  ;;  %v1453_v55 = vpop.xlane.xlu1 %1452 }
 0x2f2   : > { %v1530_v39 = vsel %vm1498_vm6, %v1482_v31, %v1514_v36  ;;  %v3212_v40 = vadd.f32 %v2327_v26, %v1531_v38  ;;  %v1486_v56 = vadd.f32 %v3171_v49, %v1453_v55  ;;  %v1475_v59 = vadd.f32 %v3171_v49, %v1431_v48 }
 0x2f3   : > { %v3214_v29 = vadd.f32 %v2326_v37, %v1530_v39  ;;  %v1505_v42 = vmul.f32 0.2, %v1473_v24  ;;  %vm1489_vm8 = vcmp.gt.f32.partialorder %v1473_v24, 0.0  ;;  %v1532_v44 = vsel %vm1500_vm7, %v1484_v18, %v1516_v21 }
 0x2f4   : > { %v3220_v46 = vadd.f32 %v2330_v43, %v1532_v44  ;;  %v2331_v61 = vunpack.c.h.bf16 %v2341_v41  ;;  %vm1502_vm10 = vcmp.gt.f32.partialorder %v1486_v56, 0.0  ;;  %v1507_v12 = vmul.f32 0.2, %v1475_v59  ;;  %v2337_v41 = vld [vmem:[%s2931_s13 + $0x10] sm:$0xff]  }
 0x2f5   : > { %v1521_v45 = vsel %vm1489_vm8, %v1473_v24, %v1505_v42  ;;  %vm1491_vm11 = vcmp.gt.f32.partialorder %v1475_v59, 0.0  ;;  %v2311_v17 = vunpack.c.h.bf16 %v2336_v13  ;;  %v2310_v25 = vunpack.c.l.bf16 %v2336_v13 }
 0x2f6   : > { %v3222_v47 = vadd.f32 %v2307_v10, %v1521_v45  ;;  %v1523_v27 = vsel %vm1491_vm11, %v1475_v59, %v1507_v12  ;;  %v2335_v37 = vunpack.c.h.bf16 %v2342_v6  ;;  %v2315_v45 = vunpack.c.h.bf16 %v2337_v41 }
 0x2f8   : > { %1428 = vadd.xlane.f32.xlu0 %v1410_v19  ;;  %1450 = vadd.xlane.f32.xlu2 %v1421_v9  ;;  %v2334_v19 = vunpack.c.l.bf16 %v2342_v6 }
 0x2f9   : > { %v1435_v16 = vpop.xlane.xlu1 %1434 }
 0x2fa   : > { %v1477_v36 = vadd.f32 %v3171_v49, %v1435_v16 }
 0x2fc   : > { %v1509_v21 = vmul.f32 0.2, %v1477_v36  ;;  %vm1493_vm14 = vcmp.gt.f32.partialorder %v1477_v36, 0.0 }
 0x300   : > { %1602 = vmax.xlane.f32.xlu0 %v3197_v7  ;;  %1600 = vmax.xlane.f32.xlu2 %v3199_v30 }
 0x308   : > { %1432 = vadd.xlane.f32.xlu0 %v1412_v32  ;;  %1454 = vadd.xlane.f32.xlu2 %v1423_v33  ;;  %v3247_v33 = vadd.f32 %v2311_v17, %v1523_v27 }
 0x310   : > { %1606 = vmax.xlane.f32.xlu0 %v3212_v40  ;;  %1604 = vmax.xlane.f32.xlu2 %v3214_v29 }
 0x318   : > { %1608 = vmax.xlane.f32.xlu0 %v3220_v46  ;;  %1586 = vmax.xlane.f32.xlu2 %v3222_v47 }
 0x363   : > { %v1599_v3 = vpop.xlane.xlu0 %1598  ;;  %v1597_v51 = vpop.xlane.xlu2 %1596 }
 0x364   : > { %v1623_v52 = vsub.f32 %v3181_v1, %v1599_v3  ;;  %v1622_v53 = vsub.f32 %v3183_v2, %v1597_v51  ;;  %v1518_v2 = vmul.f32 0.2, %v1486_v56  ;;  %v1585_v26 = vpop.xlane.xlu1 %1584  ;;  %v1525_v3 = vsel %vm1493_vm14, %v1477_v36, %v1509_v21 }
 0x365   : > { %v1616_v42 = vsub.f32 %v3185_v11, %v1585_v26  ;;  %v2314_v11 = vunpack.c.l.bf16 %v2337_v41 }
 0x366   : > { %v1646_v54 = vmul.f32 1.442695, %v1623_v52  ;;  %v1644_v50 = vmul.f32 1.442695, %v1622_v53  ;;  %v1534_v20 = vsel %vm1502_vm10, %v1486_v56, %v1518_v2 }
 0x367   : > { %v3245_v4 = vadd.f32 %v2334_v19, %v1534_v20  ;;  %v1632_v51 = vmul.f32 1.442695, %v1616_v42 }
 0x368   : > { %2429 = vpow2.f32 %v1646_v54 }
 0x369   : > { %2431 = vpow2.f32 %v1644_v50  ;;  %v3270_v50 = vadd.f32 %v2315_v45, %v1525_v3 }
 0x36b   : > { %v1429_v57 = vpop.xlane.xlu0 %1428  ;;  %v1451_v58 = vpop.xlane.xlu2 %1450 }
 0x36c   : > { %v1485_v60 = vadd.f32 %v3171_v49, %v1451_v58  ;;  %v1474_v0 = vadd.f32 %v3171_v49, %v1429_v57 }
 0x36e   : > { %v3231_v62 = vpop.eup %2429  ;;  %v1517_v1 = vmul.f32 0.2, %v1485_v60  ;;  %vm1501_vm9 = vcmp.gt.f32.partialorder %v1485_v60, 0.0  ;;  %v1506_v9 = vmul.f32 0.2, %v1474_v0  ;;  %vm1490_vm12 = vcmp.gt.f32.partialorder %v1474_v0, 0.0 }
 0x36f   : > { %v3235_v8 = vpop.eup %2431  ;;  %1678 = vadd.xlane.f32.xlu0 %v3231_v62 }
 0x370   : > { %1676 = vadd.xlane.f32.xlu2 %v3235_v8  ;;  %v1533_v14 = vsel %vm1501_vm9, %v1485_v60, %v1517_v1  ;;  %v1522_v34 = vsel %vm1490_vm12, %v1474_v0, %v1506_v9 }
 0x371   : > { %v3240_v15 = vadd.f32 %v2331_v61, %v1533_v14  ;;  %v3251_v35 = vadd.f32 %v2310_v25, %v1522_v34 }
 0x373   : > { %v1603_v22 = vpop.xlane.xlu0 %1602  ;;  %v1601_v23 = vpop.xlane.xlu2 %1600  ;;  %1610 = vmax.xlane.f32.xlu1 %v3240_v15 }
 0x374   : > { %v1625_v28 = vsub.f32 %v3197_v7, %v1603_v22  ;;  %v1624_v63 = vsub.f32 %v3199_v30, %v1601_v23 }
 0x376   : > { %v1650_v31 = vmul.f32 1.442695, %v1625_v28  ;;  %v1648_v32 = vmul.f32 1.442695, %v1624_v63 }
 0x377   : > { %1612 = vmax.xlane.f32.xlu0 %v3245_v4 }
 0x378   : > { %2433 = vpow2.f32 %v1650_v31  ;;  %1590 = vmax.xlane.f32.xlu2 %v3247_v33 }
 0x379   : > { %2435 = vpow2.f32 %v1648_v32 }
 0x37a   : > { %2437 = vpow2.f32 %v1632_v51 }
 0x37b   : > { %v1433_v7 = vpop.xlane.xlu0 %1432  ;;  %v1455_v30 = vpop.xlane.xlu2 %1454  ;;  %1588 = vmax.xlane.f32.xlu1 %v3251_v35 }
 0x37c   : > { %v1487_v5 = vadd.f32 %v3171_v49, %v1455_v30  ;;  %v1476_v39 = vadd.f32 %v3171_v49, %v1433_v7 }
 0x37e   : > { %v3256_v38 = vpop.eup %2433  ;;  %v1519_v18 = vmul.f32 0.2, %v1487_v5  ;;  %vm1503_vm13 = vcmp.gt.f32.partialorder %v1487_v5, 0.0  ;;  %v1508_v44 = vmul.f32 0.2, %v1476_v39  ;;  %vm1492_vm15 = vcmp.gt.f32.partialorder %v1476_v39, 0.0 }
 0x37f   : > { %v3259_v24 = vpop.eup %2435  ;;  %1682 = vadd.xlane.f32.xlu0 %v3256_v38 }
 0x380   : > { %1680 = vadd.xlane.f32.xlu2 %v3259_v24  ;;  %v1535_v43 = vsel %vm1503_vm13, %v1487_v5, %v1519_v18  ;;  %v1524_v55 = vsel %vm1492_vm15, %v1476_v39, %v1508_v44  ;;  %v3278_v60 = vpop.eup %2437 }
 0x381   : > { %v3265_v10 = vadd.f32 %v2335_v37, %v1535_v43  ;;  %v3273_v57 = vadd.f32 %v2314_v11, %v1524_v55 }
 0x383   : > { %v1607_v48 = vpop.xlane.xlu0 %1606  ;;  %v1605_v49 = vpop.xlane.xlu2 %1604  ;;  %1614 = vmax.xlane.f32.xlu1 %v3265_v10 }
 0x384   : > { %v1627_v52 = vsub.f32 %v3212_v40, %v1607_v48  ;;  %v1626_v53 = vsub.f32 %v3214_v29, %v1605_v49 }
 0x386   : > { %v1652_v54 = vmul.f32 1.442695, %v1626_v53  ;;  %v1654_v56 = vmul.f32 1.442695, %v1627_v52 }
 0x388   : > { %1594 = vmax.xlane.f32.xlu2 %v3270_v50  ;;  %2439 = vpow2.f32 %v1652_v54 }
 0x389   : > { %2441 = vpow2.f32 %v1654_v56 }
 0x38b   : > { %v1609_v58 = vpop.xlane.xlu0 %1608  ;;  %v1587_v59 = vpop.xlane.xlu2 %1586  ;;  %1592 = vmax.xlane.f32.xlu1 %v3273_v57 }
 0x38c   : > { %v1628_v40 = vsub.f32 %v3220_v46, %v1609_v58  ;;  %v1617_v29 = vsub.f32 %v3222_v47, %v1587_v59 }
 0x38e   : > { %v1634_v61 = vmul.f32 1.442695, %v1617_v29  ;;  %v3280_v0 = vpop.eup %2439  ;;  %v1656_v1 = vmul.f32 1.442695, %v1628_v40  ;;  %v3330_v29 = vpop.f32.mrf.mxu0 }
 0x38f   : > { %1684 = vadd.xlane.f32.xlu0 %v3280_v0  ;;  %v3284_v2 = vpop.eup %2441 }
 0x390   : > { %1664 = vadd.xlane.f32.xlu2 %v3278_v60  ;;  %2443 = vpow2.f32 %v1634_v61 }
 0x391   : > { %2445 = vpow2.f32 %v1656_v1 }
 0x393   : > { %1686 = vadd.xlane.f32.xlu1 %v3284_v2 }
 0x396   : > { %v3287_v6 = vpop.eup %2443  ;;  %v3332_v61 = vpop.f32.mrf.mxu0 }
 0x397   : > { %1666 = vadd.xlane.f32.xlu0 %v3287_v6  ;;  %v3290_v46 = vpop.eup %2445 }
 0x39b   : > { %1688 = vadd.xlane.f32.xlu1 %v3290_v46 }
 0x39e   : > { %v3334_v1 = vpop.f32.mrf.mxu0 }
 0x3e2   : > { %v1679_v47 = vpop.xlane.xlu0 %1678 }
 0x3e3   : > { %2447 = vrcp.f32 %v1679_v47  ;;  %v1677_v12 = vpop.xlane.xlu2 %1676  ;;  %v3336_v47 = vpop.f32.mrf.mxu0 }
 0x3e4   : > { %2449 = vrcp.f32 %v1677_v12 }
 0x3e6   : > { %v1611_v13 = vpop.xlane.xlu1 %1610 }
 0x3e7   : > { %v1629_v14 = vsub.f32 %v3240_v15, %v1611_v13 }
 0x3e9   : > { %v2448_v19 = vpop.eup %2447  ;;  %v1658_v9 = vmul.f32 1.442695, %v1629_v14 }
 0x3ea   : > { %v2450_v20 = vpop.eup %2449  ;;  %v1613_v17 = vpop.xlane.xlu0 %1612  ;;  %v1719_v22 = vmul.f32 %v2448_v19, %v3231_v62 }
 0x3eb   : > { %2451 = vpow2.f32 %v1658_v9  ;;  %v1630_v23 = vsub.f32 %v3245_v4, %v1613_v17  ;;  %v1591_v27 = vpop.xlane.xlu2 %1590  ;;  %v1718_v28 = vmul.f32 %v2450_v20, %v3235_v8 }
 0x3ec   : > { %v1619_v63 = vsub.f32 %v3247_v33, %v1591_v27 }
 0x3ed   : > { %v1731_v16 = vpack.c.bf16 %v1719_v22, %v1718_v28  ;;  %v1660_v25 = vmul.f32 1.442695, %v1630_v23  ;;  %v3346_v22 = vld [vmem:[%s519_s17] ss:$0 sm:$0xff] }
 0x3ee   : > { %v1638_v31 = vmul.f32 1.442695, %v1619_v63  ;;  %v1589_v32 = vpop.xlane.xlu1 %1588 }
 0x3ef   : > { %v1618_v15 = vsub.f32 %v3251_v35, %v1589_v32  ;;  %1771 = vmatmul.bf16.vlgmr.msrb.gmra.mxu2 %v1731_v16 }
 0x3f0   : > { %2453 = vpow2.f32 %v1638_v31 }
 0x3f1   : > { %v3300_v34 = vpop.eup %2451  ;;  %v1636_v62 = vmul.f32 1.442695, %v1618_v15  ;;  %2455 = vpow2.f32 %v1660_v25 }
 0x3f2   : > { %v1683_v7 = vpop.xlane.xlu0 %1682  ;;  %1690 = vadd.xlane.f32.xlu2 %v3300_v34 }
 0x3f3   : > { %2457 = vpow2.f32 %v1636_v62  ;;  %v1681_v8 = vpop.xlane.xlu2 %1680 }
 0x3f4   : > { %2459 = vrcp.f32 %v1683_v7 }
 0x3f5   : > { %2461 = vrcp.f32 %v1681_v8 }
 0x3f6   : > { %v3303_v4 = vpop.eup %2453  ;;  %v1615_v33 = vpop.xlane.xlu1 %1614 }
 0x3f7   : > { %1670 = vadd.xlane.f32.xlu1 %v3303_v4  ;;  %v1631_v35 = vsub.f32 %v3265_v10, %v1615_v33  ;;  %v3307_v30 = vpop.eup %2455 }
 0x3f9   : > { %v3309_v36 = vpop.eup %2457  ;;  %v1662_v5 = vmul.f32 1.442695, %v1631_v35 }
 0x3fa   : > { %v2460_v26 = vpop.eup %2459  ;;  %1692 = vadd.xlane.f32.xlu2 %v3307_v30  ;;  %1668 = vadd.xlane.f32.xlu0 %v3309_v36 }
 0x3fb   : > { %v2462_v37 = vpop.eup %2461  ;;  %2463 = vpow2.f32 %v1662_v5  ;;  %v1595_v39 = vpop.xlane.xlu2 %1594  ;;  %v1721_v18 = vmul.f32 %v2460_v26, %v3256_v38 }
 0x3fc   : > { %v1621_v21 = vsub.f32 %v3270_v50, %v1595_v39  ;;  %v1720_v41 = vmul.f32 %v2462_v37, %v3259_v24 }
 0x3fe   : > { %v1642_v42 = vmul.f32 1.442695, %v1621_v21  ;;  %v1593_v43 = vpop.xlane.xlu1 %1592  ;;  %v1732_v10 = vpack.c.bf16 %v1721_v18, %v1720_v41 }
 0x3ff   : > { %v1620_v44 = vsub.f32 %v3273_v57, %v1593_v43 }
 0x400   : > { %2465 = vpow2.f32 %v1642_v42  ;;  %1776 = vmatmul.bf16.gmra.mxu2 %v1732_v10 }
 0x401   : > { %v3317_v45 = vpop.eup %2463  ;;  %v1640_v48 = vmul.f32 1.442695, %v1620_v44 }
 0x402   : > { %1694 = vadd.xlane.f32.xlu0 %v3317_v45  ;;  %v1685_v49 = vpop.xlane.xlu0 %1684 }
 0x403   : > { %2467 = vpow2.f32 %v1640_v48  ;;  %v1665_v51 = vpop.xlane.xlu2 %1664 }
 0x404   : > { %2469 = vrcp.f32 %v1685_v49 }
 0x406   : > { %v3320_v38 = vpop.eup %2465  ;;  %v1687_v3 = vpop.xlane.xlu1 %1686 }
 0x407   : > { %1674 = vadd.xlane.f32.xlu2 %v3320_v38  ;;  %2471 = vrcp.f32 %v1687_v3 }
 0x408   : > { %2473 = vrcp.f32 %v1665_v51 }
 0x409   : > { %v3323_v24 = vpop.eup %2467 }
 0x40a   : > { %1672 = vadd.xlane.f32.xlu1 %v3323_v24  ;;  %v2470_v52 = vpop.eup %2469  ;;  %v1667_v53 = vpop.xlane.xlu0 %1666 }
 0x40b   : > { %2475 = vrcp.f32 %v1667_v53  ;;  %v1722_v54 = vmul.f32 %v2470_v52, %v3280_v0  ;;  %v3338_v0 = vpop.f32.mrf.mxu0 }
 0x40d   : > { %v2472_v11 = vpop.eup %2471 }
 0x40e   : > { %v1723_v50 = vmul.f32 %v2472_v11, %v3284_v2  ;;  %v2474_v55 = vpop.eup %2473  ;;  %v1689_v2 = vpop.xlane.xlu1 %1688 }
 0x40f   : > { %v1712_v58 = vmul.f32 %v2474_v55, %v3278_v60  ;;  %2477 = vrcp.f32 %v1689_v2 }
 0x410   : > { %v1733_v56 = vpack.c.bf16 %v1723_v50, %v1722_v54 }
 0x411   : > { %v2476_v57 = vpop.eup %2475 }
 0x412   : > { %1781 = vmatmul.bf16.gmra.mxu2 %v1733_v56  ;;  %v1713_v59 = vmul.f32 %v2476_v57, %v3287_v6 }
 0x413   : > { %v3340_v12 = vpop.f32.mrf.mxu0 }
 0x414   : > { %v1728_v40 = vpack.c.bf16 %v1713_v59, %v1712_v58 }
 0x415   : > { %v2478_v6 = vpop.eup %2477 }
 0x416   : > { %1756 = vmatmul.bf16.vlgmr.msra.gmra.mxu1 %v1728_v40  ;;  %v1724_v20 = vmul.f32 %v2478_v6, %v3290_v46 }
 0x41b   : > { %v1379_v19 = vpop.f32.mrf.mxu0 }
 0x465   : > { %v1691_v60 = vpop.xlane.xlu2 %1690 }
 0x466   : > { %2479 = vrcp.f32 %v1691_v60 }
 0x46a   : > { %v1671_v13 = vpop.xlane.xlu1 %1670 }
 0x46b   : > { %2481 = vrcp.f32 %v1671_v13 }
 0x46c   : > { %v2480_v14 = vpop.eup %2479 }
 0x46d   : > { %v1669_v9 = vpop.xlane.xlu0 %1668  ;;  %v1725_v17 = vmul.f32 %v2480_v14, %v3300_v34  ;;  %v1693_v27 = vpop.xlane.xlu2 %1692 }
 0x46e   : > { %2483 = vrcp.f32 %v1669_v9  ;;  %v1381_v34 = vpop.f32.mrf.mxu0 }
 0x46f   : > { %v1734_v23 = vpack.c.bf16 %v1725_v17, %v1724_v20  ;;  %2485 = vrcp.f32 %v1693_v27 }
 0x471   : > { %1786 = vmatmul.bf16.gmra.mxu2 %v1734_v23  ;;  %v2482_v63 = vpop.eup %2481 }
 0x472   : > { %v1772_v28 = vpop.f32.mrf.mxu2  ;;  %v1715_v15 = vmul.f32 %v2482_v63, %v3303_v4 }
 0x473   : > { %v1773_v16 = vadd.f32 %v3346_v22, %v1772_v28 }
 0x474   : > { %v2484_v46 = vpop.eup %2483 }
 0x475   : > { %v1803_v25 = vadd.f32 %v1773_v16, %v1379_v19  ;;  %v1695_v31 = vpop.xlane.xlu0 %1694  ;;  %v1714_v32 = vmul.f32 %v2484_v46, %v3309_v36  ;;  %v2486_v7 = vpop.eup %2485 }
 0x476   : > { %2487 = vrcp.f32 %v1695_v31  ;;  %v1726_v39 = vmul.f32 %v2486_v7, %v3307_v30  ;;  %v1384_v18 = vpop.f32.mrf.mxu0 }
 0x477   : > { %1819 = vst [vmem:[%s3353_s5 + $0x30] sm:$0xff] %v1803_v25  ;;  %v1729_v62 = vpack.c.bf16 %v1715_v15, %v1714_v32 }
 0x479   : > { %1761 = vmatmul.bf16.gmra.mxu1 %v1729_v62 }
 0x47a   : > { %v1675_v8 = vpop.xlane.xlu2 %1674  ;;  %v1774_v33 = vpop.f32.mrf.mxu2 }
 0x47b   : > { %v1775_v35 = vadd.f32 %v3346_v22, %v1774_v33  ;;  %2489 = vrcp.f32 %v1675_v8 }
 0x47c   : > { %v2488_v5 = vpop.eup %2487 }
 0x47d   : > { %v1804_v26 = vadd.f32 %v1775_v35, %v1381_v34  ;;  %v1673_v37 = vpop.xlane.xlu1 %1672  ;;  %v1727_v36 = vmul.f32 %v2488_v5, %v3317_v45 }
 0x47e   : > { %2491 = vrcp.f32 %v1673_v37  ;;  %v1386_v45 = vpop.f32.mrf.mxu0 }
 0x47f   : > { %1820 = vst [vmem:[%s3353_s5 + $0x38] sm:$0xff] %v1804_v26  ;;  %v1735_v4 = vpack.c.bf16 %v1727_v36, %v1726_v39 }
 0x481   : > { %1791 = vmatmul.bf16.gmra.mxu2 %v1735_v4  ;;  %v2490_v21 = vpop.eup %2489 }
 0x482   : > { %v1717_v44 = vmul.f32 %v2490_v21, %v3320_v38 }
 0x483   : > { %v1777_v41 = vpop.f32.mrf.mxu2 }
 0x484   : > { %v2492_v42 = vpop.eup %2491  ;;  %v1778_v43 = vadd.f32 %v3346_v22, %v1777_v41 }
 0x485   : > { %v1716_v10 = vmul.f32 %v2492_v42, %v3323_v24 }
 0x486   : > { %v1805_v48 = vadd.f32 %v1778_v43, %v1384_v18  ;;  %v1389_v53 = vpop.f32.mrf.mxu0 }
 0x487   : > { %v1730_v30 = vpack.c.bf16 %v1717_v44, %v1716_v10 }
 0x488   : > { %1821 = vst [vmem:[%s3353_s5 + $0x40] sm:$0xff] %v1805_v48 }
 0x489   : > { %1766 = vmatmul.bf16.gmra.mxu1 %v1730_v30 }
 0x48b   : > { %v1779_v49 = vpop.f32.mrf.mxu2 }
 0x48c   : > { %v1780_v3 = vadd.f32 %v3346_v22, %v1779_v49 }
 0x48e   : > { %v1806_v51 = vadd.f32 %v1780_v3, %v1386_v45  ;;  %v1391_v59 = vpop.f32.mrf.mxu0 }
 0x490   : > { %1822 = vst [vmem:[%s3353_s5 + $0x48] sm:$0xff] %v1806_v51 }
 0x493   : > { %v1757_v52 = vpop.f32.mrf.mxu1 }
 0x494   : > { %v1758_v24 = vadd.f32 %v3346_v22, %v1757_v52 }
 0x495   : > { %v1782_v11 = vpop.f32.mrf.mxu2 }
 0x496   : > { %v1783_v38 = vadd.f32 %v3346_v22, %v1782_v11  ;;  %v1797_v54 = vadd.f32 %v1758_v24, %v3330_v29  ;;  %v1394_v60 = vpop.f32.mrf.mxu0 }
 0x498   : > { %v1807_v50 = vadd.f32 %v1783_v38, %v1389_v53  ;;  %1813 = vst [vmem:[%s3353_s5] sm:$0xff] %v1797_v54 }
 0x49a   : > { %1823 = vst [vmem:[%s3353_s5 + $0x50] sm:$0xff] %v1807_v50 }
 0x49b   : > { %v1759_v55 = vpop.f32.mrf.mxu1 }
 0x49c   : > { %v1760_v56 = vadd.f32 %v3346_v22, %v1759_v55 }
 0x49d   : > { %v1784_v57 = vpop.f32.mrf.mxu2 }
 0x49e   : > { %v1785_v58 = vadd.f32 %v3346_v22, %v1784_v57  ;;  %v1798_v40 = vadd.f32 %v1760_v56, %v3332_v61  ;;  %v1396_v9 = vpop.f32.mrf.mxu0 }
 0x4a0   : > { %v1808_v2 = vadd.f32 %v1785_v58, %v1391_v59  ;;  %1814 = vst [vmem:[%s3353_s5 + $0x8] sm:$0xff] %v1798_v40 }
 0x4a2   : > { %1824 = vst [vmem:[%s3353_s5 + $0x58] sm:$0xff] %v1808_v2 }
 0x4a6   : > { %v1399_v16 = vpop.f32.mrf.mxu0 }
 0x4ae   : > { %v1401_v7 = vpop.f32.mrf.mxu0 }
 0x4f4   : > { %v1787_v29 = vpop.f32.mrf.mxu2 }
 0x4f5   : > { %v1788_v6 = vadd.f32 %v3346_v22, %v1787_v29 }
 0x4f6   : > { %v1762_v14 = vpop.f32.mrf.mxu1 }
 0x4f7   : > { %v1809_v13 = vadd.f32 %v1788_v6, %v1394_v60  ;;  %v1763_v19 = vadd.f32 %v3346_v22, %v1762_v14 }
 0x4f9   : > { %1825 = vst [vmem:[%s3353_s5 + $0x60] sm:$0xff] %v1809_v13  ;;  %v1799_v20 = vadd.f32 %v1763_v19, %v3334_v1 }
 0x4fb   : > { %1815 = vst [vmem:[%s3353_s5 + $0x10] sm:$0xff] %v1799_v20 }
 0x4fc   : > { %v1789_v61 = vpop.f32.mrf.mxu2 }
 0x4fd   : > { %v1790_v17 = vadd.f32 %v3346_v22, %v1789_v61 }
 0x4fe   : > { %v1764_v27 = vpop.f32.mrf.mxu1 }
 0x4ff   : > { %v1810_v23 = vadd.f32 %v1790_v17, %v1396_v9  ;;  %v1765_v28 = vadd.f32 %v3346_v22, %v1764_v27 }
 0x501   : > { %1826 = vst [vmem:[%s3353_s5 + $0x68] sm:$0xff] %v1810_v23  ;;  %v1800_v63 = vadd.f32 %v1765_v28, %v3336_v47 }
 0x503   : > { %1816 = vst [vmem:[%s3353_s5 + $0x18] sm:$0xff] %v1800_v63 }
 0x504   : > { %v1792_v46 = vpop.f32.mrf.mxu2 }
 0x505   : > { %v1793_v1 = vadd.f32 %v3346_v22, %v1792_v46 }
 0x506   : > { %v1767_v31 = vpop.f32.mrf.mxu1 }
 0x507   : > { %v1811_v25 = vadd.f32 %v1793_v1, %v1399_v16  ;;  %v1768_v32 = vadd.f32 %v3346_v22, %v1767_v31 }
 0x509   : > { %1827 = vst [vmem:[%s3353_s5 + $0x70] sm:$0xff] %v1811_v25  ;;  %v1801_v15 = vadd.f32 %v1768_v32, %v3338_v0 }
 0x50b   : > { %1817 = vst [vmem:[%s3353_s5 + $0x20] sm:$0xff] %v1801_v15 }
 0x50c   : > { %v1794_v34 = vpop.f32.mrf.mxu2 }
 0x50d   : > { %v1795_v62 = vadd.f32 %v3346_v22, %v1794_v34 }
 0x50e   : > { %v1769_v8 = vpop.f32.mrf.mxu1 }
 0x50f   : > { %v1812_v47 = vadd.f32 %v1795_v62, %v1401_v7  ;;  %v1770_v33 = vadd.f32 %v3346_v22, %v1769_v8 }
 0x511   : > { %1828 = vst [vmem:[%s3353_s5 + $0x78] sm:$0xff] %v1812_v47  ;;  %v1802_v35 = vadd.f32 %v1770_v33, %v3340_v12 }
 0x513   : > { %1818 = vst [vmem:[%s3353_s5 + $0x28] sm:$0xff] %v1802_v35 }
 0x514 PF: > { %s3456_s16 = sld [smem:[#allocation14_spill]]  ;;  %s3459_s13 = smov %s2677_s14 }
 0x515   : > { %s3457_s15 = sld [smem:[#allocation13_spill]] }
 0x516   : > { %s3458_s24 = sld [smem:[#allocation15_spill]] }
 0x51a   : > { %p26_p7 = scmp.ge.s32.totalorder %s3456_s16, 5  }
 0x51b   : > { %s3460_s14 = smov %s3457_s15 }
 0x51c   : > { %s3461_s15 = smov %s3458_s24  ;;  %28 = sbr.rel (!%p26_p7) target bundleno = 15 (0xf), region = 163 }
 0x521   :  { %1850 = vsyncpa [#allocation3], 1 }
 0x522   :  { %1852 = vsyncpa [#allocation3 + $0x1], 1 }
 0x523   :  { %1853 = vsyncpa [#allocation5], 1 }
 0x524   :  { %1855 = vsyncpa [#allocation5 + $0x1], 1 }
 0x525   :  { %1856 = vsyncpa [#allocation8], 1 }
 0x526   :  { %1858 = vsyncpa [#allocation8 + $0x1], 1 }

</bundles_post_ra>
